<compile_context>
chip_gen: v7x
topology: tpu7x:2x2x1
jax: 0.10.0
libtpu: 0.0.40
codegen_flags: <defaults>
</compile_context>

<pallas_src>
import functools

import jax
import jax.numpy as jnp
from jax.experimental import pallas as pl
from jax.experimental.pallas import tpu as pltpu

IN_FEATURES = 28 * 28          # 784 (flattened 1x28x28)
HIDDEN = 512
OUT_FEATURES = 10
OUT_PAD = 128                  # lane-dense padded logits width
TB_MAX = 512                   # max batch tile: amortizes per-step overhead,
                               # still fits comfortably in v5e's 16 MiB scoped VMEM


def mlp_kernel(x_ref, w1_ref, b1_ref, w2_ref, b2_ref, w3_ref, b3_ref, o_ref):
    # x: (tb, 784) f32 -> bf16 cast in-kernel (rides idle VALU slots under MXU).
    # w1: (784, 512) bf16; w2: (512, 512) bf16; w3: (512, 128) bf16 (N-padded).
    # b1/b2: (1, 512) f32; b3: (1, 128) f32.  All dots accumulate in f32 on MXU.
    x = x_ref[...].astype(jnp.bfloat16)
    h1 = jnp.dot(x, w1_ref[...], preferred_element_type=jnp.float32) + b1_ref[...]
    h1 = jnp.maximum(h1, 0.0).astype(jnp.bfloat16)
    h2 = jnp.dot(h1, w2_ref[...], preferred_element_type=jnp.float32) + b2_ref[...]
    h2 = jnp.maximum(h2, 0.0).astype(jnp.bfloat16)
    o_ref[...] = (jnp.dot(h2, w3_ref[...], preferred_element_type=jnp.float32)
                  + b3_ref[...]).astype(o_ref.dtype)


def prepack_params(params):
    """One-time packing of PyTorch-shaped (out, in) weights for the kernel.

    Transposes to (in, out), casts weights to bf16, zero-pads the last layer's
    output dim 10 -> 128 so the final store is lane-dense. Do this once per
    model, NOT per forward call.
    """
    w1 = params["w1"].T.astype(jnp.bfloat16)                       # (784, 512)
    w2 = params["w2"].T.astype(jnp.bfloat16)                       # (512, 512)
    w3 = jnp.zeros((HIDDEN, OUT_PAD), jnp.bfloat16).at[:, :OUT_FEATURES].set(
        params["w3"].T.astype(jnp.bfloat16))                       # (512, 128)
    b1 = params["b1"].reshape(1, -1).astype(jnp.float32)           # (1, 512)
    b2 = params["b2"].reshape(1, -1).astype(jnp.float32)           # (1, 512)
    b3 = jnp.zeros((1, OUT_PAD), jnp.float32).at[:, :OUT_FEATURES].set(
        params["b3"].reshape(1, -1).astype(jnp.float32))           # (1, 128)
    return {"w1": w1, "b1": b1, "w2": w2, "b2": b2, "w3": w3, "b3": b3}


def _pick_batch_tile(batch):
    """Batch tile: multiple of 16, <= TB_MAX, and (when the batch allows it)
    at least 2 grid steps so v7x megacore can shard the batch axis."""
    b_al = 16 * ((batch + 15) // 16)
    if b_al <= 32:
        return b_al                       # tiny batch: one small step
    half = 16 * (((b_al + 1) // 2 + 15) // 16)
    return min(TB_MAX, half)


@functools.partial(jax.jit, static_argnames=("tb",))
def _forward_impl(x_flat, packed, *, tb):
    B = x_flat.shape[0]
    B_pad = tb * pl.cdiv(B, tb)
    if B_pad != B:
        x_flat = jnp.pad(x_flat, ((0, B_pad - B), (0, 0)))

    # Weights/biases: constant block index -> fetched once, VMEM-resident.
    resident = lambda shape: pl.BlockSpec(shape, lambda i: (0, 0))

    out = pl.pallas_call(
        mlp_kernel,
        out_shape=jax.ShapeDtypeStruct((B_pad, OUT_PAD), jnp.float32),
        grid=(B_pad // tb,),
        in_specs=[
            # last dim 784 == full array extent -> legal without lane padding
            pl.BlockSpec((tb, IN_FEATURES), lambda i: (i, 0)),
            resident(packed["w1"].shape), resident(packed["b1"].shape),
            resident(packed["w2"].shape), resident(packed["b2"].shape),
            resident(packed["w3"].shape), resident(packed["b3"].shape),
        ],
        out_specs=pl.BlockSpec((tb, OUT_PAD), lambda i: (i, 0)),
        compiler_params=pltpu.CompilerParams(
            dimension_semantics=("parallel",)),
    )(x_flat, packed["w1"], packed["b1"], packed["w2"], packed["b2"],
      packed["w3"], packed["b3"])

    # Drop batch padding and the lane padding on the logits.
    return out[:B, :OUT_FEATURES]


def neural_network_forward(x_nchw, packed_params):
    """x_nchw: (B, 1, 28, 28) float32; packed_params: output of prepack_params."""
    B = x_nchw.shape[0]
    x_flat = x_nchw.reshape(B, IN_FEATURES)      # nn.Flatten(); free, stays f32
    tb = _pick_batch_tile(B)
    return _forward_impl(x_flat, packed_params, tb=tb)


def init_params(key):
    """Deterministic synthetic parameters with PyTorch nn.Linear shapes (out, in)."""
    ks = jax.random.split(key, 6)

    def lin(kw, kb, fan_in, fan_out):
        bound = 1.0 / jnp.sqrt(fan_in)
        w = jax.random.uniform(kw, (fan_out, fan_in), jnp.float32, -bound, bound)
        b = jax.random.uniform(kb, (fan_out,), jnp.float32, -bound, bound)
        return w, b

    w1, b1 = lin(ks[0], ks[1], IN_FEATURES, HIDDEN)
    w2, b2 = lin(ks[2], ks[3], HIDDEN, HIDDEN)
    w3, b3 = lin(ks[4], ks[5], HIDDEN, OUT_FEATURES)
    return {"w1": w1, "b1": b1, "w2": w2, "b2": b2, "w3": w3, "b3": b3}


def reference_forward(x_nchw, params):
    x = x_nchw.reshape(x_nchw.shape[0], -1)
    h = jnp.maximum(x @ params["w1"].T + params["b1"], 0.0)
    h = jnp.maximum(h @ params["w2"].T + params["b2"], 0.0)
    return h @ params["w3"].T + params["b3"]


if __name__ == "__main__":
    key = jax.random.PRNGKey(0)
    k_x, k_p = jax.random.split(key)
    B = 8  # small example batch; feature dims (784, 512, 10) fixed by the module
    x = jax.random.normal(k_x, (B, 1, 28, 28), jnp.float32)
    params = init_params(k_p)
    packed = prepack_params(params)   # one-time weight prep, outside the hot path

    logits = jax.block_until_ready(neural_network_forward(x, packed))
    ref = reference_forward(x, params)

    assert logits.shape == (B, OUT_FEATURES)
    # bf16 weights/activations with f32 accumulation -> looser tolerance than f32.
    assert jnp.allclose(logits, ref, atol=5e-2, rtol=5e-2)
    print("KERNEL_OK")
</pallas_src>

<mosaic_0001>
module attributes {stable_mosaic.version = 11 : i64} {
  func.func @mlp_kernel(%arg0: i32, %arg1: memref<16x784xf32, #tpu.memory_space<vmem>>, %arg2: memref<784x512xbf16, #tpu.memory_space<vmem>>, %arg3: memref<1x512xf32, #tpu.memory_space<vmem>>, %arg4: memref<512x512xbf16, #tpu.memory_space<vmem>>, %arg5: memref<1x512xf32, #tpu.memory_space<vmem>>, %arg6: memref<512x128xbf16, #tpu.memory_space<vmem>>, %arg7: memref<1x128xf32, #tpu.memory_space<vmem>>, %arg8: memref<16x128xf32, #tpu.memory_space<vmem>>) attributes {dimension_semantics = [#tpu.dimension_semantics<parallel>], iteration_bounds = array<i64: 1>, scalar_prefetch = 0 : i64, scratch_operands = 0 : i64, tpu.core_type = #tpu.core_type<tc>, window_params = [{transform_indices = @transform_0, window_bounds = array<i64: 16, 784>}, {pipeline_mode = #tpu.pipeline_mode<synchronous>, transform_indices = @transform_1, window_bounds = array<i64: 784, 512>}, {pipeline_mode = #tpu.pipeline_mode<synchronous>, transform_indices = @transform_2, window_bounds = array<i64: 1, 512>}, {pipeline_mode = #tpu.pipeline_mode<synchronous>, transform_indices = @transform_3, window_bounds = array<i64: 512, 512>}, {pipeline_mode = #tpu.pipeline_mode<synchronous>, transform_indices = @transform_4, window_bounds = array<i64: 1, 512>}, {pipeline_mode = #tpu.pipeline_mode<synchronous>, transform_indices = @transform_5, window_bounds = array<i64: 512, 128>}, {pipeline_mode = #tpu.pipeline_mode<synchronous>, transform_indices = @transform_6, window_bounds = array<i64: 1, 128>}, {transform_indices = @transform_7, window_bounds = array<i64: 16, 128>}]} {
    %c0 = arith.constant 0 : index
    %c0_0 = arith.constant 0 : index
    %0 = vector.load %arg1[%c0, %c0_0] : memref<16x784xf32, #tpu.memory_space<vmem>>, vector<16x784xf32>
    %1 = arith.truncf %0 : vector<16x784xf32> to vector<16x784xbf16>
    %c0_1 = arith.constant 0 : index
    %c0_2 = arith.constant 0 : index
    %2 = vector.load %arg2[%c0_1, %c0_2] : memref<784x512xbf16, #tpu.memory_space<vmem>>, vector<784x512xbf16>
    %cst = arith.constant dense<0.000000e+00> : vector<16x512xf32>
    %3 = tpu.matmul %1, %2, %cst {dimension_numbers = #tpu.dot_dimension_numbers<[1], [0], [0], [1], [0, 0, 1, 1], [], []>} : vector<16x784xbf16>, vector<784x512xbf16>, vector<16x512xf32> -> vector<16x512xf32>
    %c0_3 = arith.constant 0 : index
    %c0_4 = arith.constant 0 : index
    %4 = vector.load %arg3[%c0_3, %c0_4] : memref<1x512xf32, #tpu.memory_space<vmem>>, vector<1x512xf32>
    %5 = vector.broadcast %4 : vector<1x512xf32> to vector<16x512xf32>
    %6 = arith.addf %3, %5 : vector<16x512xf32>
    %cst_5 = arith.constant 0.000000e+00 : f32
    %7 = vector.broadcast %cst_5 : f32 to vector<16x512xf32>
    %8 = arith.maximumf %6, %7 : vector<16x512xf32>
    %9 = arith.truncf %8 : vector<16x512xf32> to vector<16x512xbf16>
    %c0_6 = arith.constant 0 : index
    %c0_7 = arith.constant 0 : index
    %10 = vector.load %arg4[%c0_6, %c0_7] : memref<512x512xbf16, #tpu.memory_space<vmem>>, vector<512x512xbf16>
    %cst_8 = arith.constant dense<0.000000e+00> : vector<16x512xf32>
    %11 = tpu.matmul %9, %10, %cst_8 {dimension_numbers = #tpu.dot_dimension_numbers<[1], [0], [0], [1], [0, 0, 1, 1], [], []>} : vector<16x512xbf16>, vector<512x512xbf16>, vector<16x512xf32> -> vector<16x512xf32>
    %c0_9 = arith.constant 0 : index
    %c0_10 = arith.constant 0 : index
    %12 = vector.load %arg5[%c0_9, %c0_10] : memref<1x512xf32, #tpu.memory_space<vmem>>, vector<1x512xf32>
    %13 = vector.broadcast %12 : vector<1x512xf32> to vector<16x512xf32>
    %14 = arith.addf %11, %13 : vector<16x512xf32>
    %cst_11 = arith.constant 0.000000e+00 : f32
    %15 = vector.broadcast %cst_11 : f32 to vector<16x512xf32>
    %16 = arith.maximumf %14, %15 : vector<16x512xf32>
    %17 = arith.truncf %16 : vector<16x512xf32> to vector<16x512xbf16>
    %c0_12 = arith.constant 0 : index
    %c0_13 = arith.constant 0 : index
    %18 = vector.load %arg6[%c0_12, %c0_13] : memref<512x128xbf16, #tpu.memory_space<vmem>>, vector<512x128xbf16>
    %cst_14 = arith.constant dense<0.000000e+00> : vector<16x128xf32>
    %19 = tpu.matmul %17, %18, %cst_14 {dimension_numbers = #tpu.dot_dimension_numbers<[1], [0], [0], [1], [0, 0, 1, 1], [], []>} : vector<16x512xbf16>, vector<512x128xbf16>, vector<16x128xf32> -> vector<16x128xf32>
    %c0_15 = arith.constant 0 : index
    %c0_16 = arith.constant 0 : index
    %20 = vector.load %arg7[%c0_15, %c0_16] : memref<1x128xf32, #tpu.memory_space<vmem>>, vector<1x128xf32>
    %21 = vector.broadcast %20 : vector<1x128xf32> to vector<16x128xf32>
    %22 = arith.addf %19, %21 : vector<16x128xf32>
    %c0_17 = arith.constant 0 : index
    %c0_18 = arith.constant 0 : index
    %23 = vector.load %arg8[%c0_17, %c0_18] : memref<16x128xf32, #tpu.memory_space<vmem>>, vector<16x128xf32>
    tpu.vector_store %arg8[%c0_17, %c0_18], %22 {strides = array<i32>} : memref<16x128xf32, #tpu.memory_space<vmem>>, vector<16x128xf32>,
    return
  }
  func.func @transform_0(%arg0: i32) -> (i32, i32) {
    %c0_i32 = arith.constant 0 : i32
    %c0_i32_0 = arith.constant 0 : i32
    return %arg0, %c0_i32 : i32, i32
  }
  func.func @transform_1(%arg0: i32) -> (i32, i32) {
    %c0_i32 = arith.constant 0 : i32
    %c0_i32_0 = arith.constant 0 : i32
    %c0_i32_1 = arith.constant 0 : i32
    return %c0_i32, %c0_i32_0 : i32, i32
  }
  func.func @transform_2(%arg0: i32) -> (i32, i32) {
    %c0_i32 = arith.constant 0 : i32
    %c0_i32_0 = arith.constant 0 : i32
    %c0_i32_1 = arith.constant 0 : i32
    return %c0_i32, %c0_i32_0 : i32, i32
  }
  func.func @transform_3(%arg0: i32) -> (i32, i32) {
    %c0_i32 = arith.constant 0 : i32
    %c0_i32_0 = arith.constant 0 : i32
    %c0_i32_1 = arith.constant 0 : i32
    return %c0_i32, %c0_i32_0 : i32, i32
  }
  func.func @transform_4(%arg0: i32) -> (i32, i32) {
    %c0_i32 = arith.constant 0 : i32
    %c0_i32_0 = arith.constant 0 : i32
    %c0_i32_1 = arith.constant 0 : i32
    return %c0_i32, %c0_i32_0 : i32, i32
  }
  func.func @transform_5(%arg0: i32) -> (i32, i32) {
    %c0_i32 = arith.constant 0 : i32
    %c0_i32_0 = arith.constant 0 : i32
    %c0_i32_1 = arith.constant 0 : i32
    return %c0_i32, %c0_i32_0 : i32, i32
  }
  func.func @transform_6(%arg0: i32) -> (i32, i32) {
    %c0_i32 = arith.constant 0 : i32
    %c0_i32_0 = arith.constant 0 : i32
    %c0_i32_1 = arith.constant 0 : i32
    return %c0_i32, %c0_i32_0 : i32, i32
  }
  func.func @transform_7(%arg0: i32) -> (i32, i32) {
    %c0_i32 = arith.constant 0 : i32
    %c0_i32_0 = arith.constant 0 : i32
    return %arg0, %c0_i32 : i32, i32
  }
}

</mosaic_0001>

<bundles_post_ra>
// kernel: _forward_impl.1
= control target key start
LH: loop header
LB: loop body
LE: loop exit
PB: predicated region body
PF: predicated region fallthrough
CT: control target
= control target key end

     0   :  { %12 = vsyncpa [#allocation3], 0  ;;  %s4197_s0 = inlined_call_operand.vmem [shape: f32[16,784], index: 0, kind: input, shape index: {}]   ;;  %s4198_s1 = inlined_call_operand.hbm [shape: bf16[784,512], index: 1, kind: input, shape index: {}]   ;;  %s4199_s2 = inlined_call_operand.vmem [shape: f32[1,512], index: 2, kind: input, shape index: {}]   ;;  %s4200_s3 = inlined_call_operand.hbm [shape: bf16[512,512], index: 3, kind: input, shape index: {}]   ;;  %s4201_s4 = inlined_call_operand.vmem [shape: f32[1,512], index: 4, kind: input, shape index: {}]   ;;  %s4202_s5 = inlined_call_operand.hbm [shape: bf16[512,128], index: 5, kind: input, shape index: {}]   ;;  %s4203_s6 = inlined_call_operand.vmem [shape: f32[1,128], index: 6, kind: input, shape index: {}]   ;;  %s4204_s7 = inlined_call_operand.vmem [shape: f32[16,128], index: 7, kind: output, shape index: {}]  }
   0x1   :  { %13 = vsyncpa [#allocation5], 0  ;;  %s4021_s24 = smov [#allocation4]   ;;  %s4022_s26 = smov [#allocation2]  }
   0x2   :  { %s35_s25 = sshll.u32 %s4021_s24, 4  ;;  %s21_s27 = sshll.u32 %s4022_s26, 4  ;;  %s36_s25 = int_to_ptr.vmem [resolvable:$true] %s35_s25  ;;  %s4069_s27 = int_to_ptr.vmem [resolvable:$true] %s21_s27 }
   0x3   :  { %s3951_s30 = scalar_lea.hbm %s4200_s3, 16384 }
   0x4   :  { %p3952_p0 = scmp.ne.s32.totalorder %s4200_s3, %s3951_s30  ;;  %p3955_p1 = scmp.lt.u32.totalorder %s3951_s30, %s4200_s3 }
   0x6   :  { %p3957_p2 = pnand %p3955_p1, %p3952_p0 }
   0x8   :  { %3960 = shalt.err (!%p3957_p2)
}
   0x9   :  { %s3961_s12 = scalar_lea.vmem %s36_s25, 16384  ;;  %p3966_p4 = scmp.lt.s32.totalorder %s36_s25, %s36_s25 }
   0xa   :  { %p3962_p3 = scmp.ne.s32.totalorder %s36_s25, %s3961_s12  ;;  %p3967_p5 = scmp.lt.s32.totalorder %s3961_s12, %s3961_s12 }
   0xc   :  { %p3968_p6 = por %p3967_p5, %p3966_p4 }
   0xe   :  { %p3969_p7 = pnand %p3968_p6, %p3962_p3 }
  0x10   :  { %3972 = shalt.err (!%p3969_p7)
}
  0x11   :  { %s4023_s13 = smov 256   ;;  %s4024_s14 = smov 16  }
  0x12   :  { %41 = dma.hbm_to_vmem [thread:$0]  %s4200_s3, 16384, %s36_s25, [#allocation5], %s4023_s13, %s4023_s13, %s4024_s14  }
  0x13   :  { %s3973_s19 = scalar_lea.hbm %s4198_s1, 25088 }
  0x14   :  { %p3974_p8 = scmp.ne.s32.totalorder %s4198_s1, %s3973_s19  ;;  %p3977_p9 = scmp.lt.u32.totalorder %s3973_s19, %s4198_s1 }
  0x16   :  { %p3979_p10 = pnand %p3977_p9, %p3974_p8 }
  0x18   :  { %3982 = shalt.err (!%p3979_p10)
}
  0x19   :  { %s3983_s24 = scalar_lea.vmem %s4069_s27, 25088  ;;  %p3988_p12 = scmp.lt.s32.totalorder %s4069_s27, %s4069_s27 }
  0x1a   :  { %p3984_p11 = scmp.ne.s32.totalorder %s4069_s27, %s3983_s24  ;;  %p3989_p13 = scmp.lt.s32.totalorder %s3983_s24, %s3983_s24 }
  0x1c   :  { %p3990_p0 = por %p3989_p13, %p3988_p12 }
  0x1e   :  { %p3991_p1 = pnand %p3990_p0, %p3984_p11 }
  0x20   :  { %3994 = shalt.err (!%p3991_p1)
}
  0x21   :  { %27 = dma.hbm_to_vmem [thread:$0]  %s4198_s1, 25088, %s4069_s27, [#allocation3], %s4023_s13, %s4023_s13, %s4024_s14  }
  0x22   :  { %s4025_s26 = smov [#allocation6]   ;;  %s3995_s8 = scalar_lea.hbm %s4202_s5, 4096 }
  0x23   :  { %s49_s28 = sshll.u32 %s4025_s26, 4  ;;  %p3996_p2 = scmp.ne.s32.totalorder %s4202_s5, %s3995_s8  ;;  %s50_s28 = int_to_ptr.vmem [resolvable:$true] %s49_s28 }
  0x24   :  { %p3999_p3 = scmp.lt.u32.totalorder %s3995_s8, %s4202_s5 }
  0x26   :  { %p4001_p4 = pnand %p3999_p3, %p3996_p2 }
  0x28   :  { %4004 = shalt.err (!%p4001_p4)
}
  0x29   :  { %s4005_s15 = scalar_lea.vmem %s50_s28, 4096  ;;  %p4010_p6 = scmp.lt.s32.totalorder %s50_s28, %s50_s28 }
  0x2a   :  { %p4006_p5 = scmp.ne.s32.totalorder %s50_s28, %s4005_s15  ;;  %p4011_p7 = scmp.lt.s32.totalorder %s4005_s15, %s4005_s15 }
  0x2c   :  { %p4012_p8 = por %p4011_p7, %p4010_p6 }
  0x2e   :  { %p4013_p9 = pnand %p4012_p8, %p4006_p5 }
  0x30   :  { %4016 = shalt.err (!%p4013_p9)
}
  0x31   :  { %s4026_s1 = smov 64   ;;  %s4027_s27 = smov 4  }
  0x32   :  { %55 = dma.hbm_to_vmem [thread:$0]  %s4202_s5, 4096, %s50_s28, [#allocation5], %s4026_s1, %s4026_s1, %s4027_s27  }
  0x33   :  { %4017 = dma.done.wait [#allocation3], 25088  }
  0x34   :  { %4018 = vsyncadd [#allocation3], 4294942208 }
  0x35   :  { %4019 = dma.done.wait [#allocation5], 20480  }
  0x36   :  { %4020 = vsyncadd [#allocation5], 4294946816  ;;  %v3433_v0 = vld [vmem:[#allocation2 + $0x4] ss:$16 sps:$4 sm:$0xff]   ;;  %v3435_v1 = vld [vmem:[#allocation2 + $0xc] ss:$16 sps:$4 sm:$0xff]  }
  0x37   :  { %1291 = vmatprep.subr.bf16.mxu0 %v3433_v0  ;;  %v3437_v2 = vld [vmem:[#allocation2] ss:$16 sps:$4 sm:$0xff]   ;;  %v3438_v3 = vld [vmem:[#allocation2 + $0x8] ss:$16 sps:$4 sm:$0xff]   ;;  %1463 = vmatprep.subr.bf16.mxu1 %v3435_v1  ;;  %v3439_v4 = vld [vmem:[#allocation2 + $0x24] ss:$16 sps:$4 sm:$0xff]  }
  0x38   :  { %1292 = vmatpush1.bf16.msra.mxu0 %v3437_v2  ;;  %1464 = vmatpush1.bf16.msra.mxu1 %v3438_v3  ;;  %v3441_v5 = vld [vmem:[#allocation2 + $0x2c] ss:$16 sps:$4 sm:$0xff]   ;;  %v3443_v6 = vld [vmem:[#allocation2 + $0x20] ss:$16 sps:$4 sm:$0xff]   ;;  %v3444_v7 = vld [vmem:[#allocation2 + $0x28] ss:$16 sps:$4 sm:$0xff]  }
  0x39   :  { %1293 = vmatprep.subr.bf16.mxu0 %v3439_v4  ;;  %1465 = vmatprep.subr.bf16.mxu1 %v3441_v5  ;;  %v3445_v8 = vld [vmem:[#allocation2 + $0x44] ss:$16 sps:$4 sm:$0xff]   ;;  %v3447_v9 = vld [vmem:[#allocation2 + $0x4c] ss:$16 sps:$4 sm:$0xff]   ;;  %v3449_v10 = vld [vmem:[#allocation2 + $0x40] ss:$16 sps:$4 sm:$0xff]  }
  0x3a   :  { %v3450_v11 = vld [vmem:[#allocation2 + $0x48] ss:$16 sps:$4 sm:$0xff]   ;;  %v3451_v12 = vld [vmem:[#allocation2 + $0x64] ss:$16 sps:$4 sm:$0xff]   ;;  %v3453_v13 = vld [vmem:[#allocation2 + $0x6c] ss:$16 sps:$4 sm:$0xff]  }
  0x3b   :  { %v3455_v14 = vld [vmem:[#allocation2 + $0x60] ss:$16 sps:$4 sm:$0xff]   ;;  %v3456_v15 = vld [vmem:[#allocation2 + $0x68] ss:$16 sps:$4 sm:$0xff]   ;;  %v3457_v16 = vld [vmem:[#allocation2 + $0x84] ss:$16 sps:$4 sm:$0xff]  }
  0x3c   :  { %1294 = vmatpush1.bf16.msra.mxu0 %v3443_v6  ;;  %1466 = vmatpush1.bf16.msra.mxu1 %v3444_v7  ;;  %v3459_v17 = vld [vmem:[#allocation2 + $0x8c] ss:$16 sps:$4 sm:$0xff]   ;;  %v3461_v18 = vld [vmem:[#allocation2 + $0x80] ss:$16 sps:$4 sm:$0xff]   ;;  %v3462_v19 = vld [vmem:[#allocation2 + $0x88] ss:$16 sps:$4 sm:$0xff]  }
  0x3d   :  { %1295 = vmatprep.subr.bf16.mxu0 %v3445_v8  ;;  %1467 = vmatprep.subr.bf16.mxu1 %v3447_v9  ;;  %v3463_v20 = vld [vmem:[#allocation2 + $0xa4] ss:$16 sps:$4 sm:$0xff]   ;;  %v3465_v21 = vld [vmem:[#allocation2 + $0xac] ss:$16 sps:$4 sm:$0xff]   ;;  %v3467_v22 = vld [vmem:[#allocation2 + $0xa0] ss:$16 sps:$4 sm:$0xff]  }
  0x3e   :  { %v3468_v23 = vld [vmem:[#allocation2 + $0xa8] ss:$16 sps:$4 sm:$0xff]   ;;  %v3469_v24 = vld [vmem:[#allocation2 + $0xc4] ss:$16 sps:$4 sm:$0xff]   ;;  %v3471_v25 = vld [vmem:[#allocation2 + $0xcc] ss:$16 sps:$4 sm:$0xff]  }
  0x3f   :  { %v3473_v26 = vld [vmem:[#allocation2 + $0xc0] ss:$16 sps:$4 sm:$0xff]   ;;  %v3474_v27 = vld [vmem:[#allocation2 + $0xc8] ss:$16 sps:$4 sm:$0xff]   ;;  %v3475_v28 = vld [vmem:[#allocation2 + $0xe4] ss:$16 sps:$4 sm:$0xff]  }
  0x40   :  { %1296 = vmatpush1.bf16.msra.mxu0 %v3449_v10  ;;  %1468 = vmatpush1.bf16.msra.mxu1 %v3450_v11  ;;  %v3477_v29 = vld [vmem:[#allocation2 + $0xec] ss:$16 sps:$4 sm:$0xff]   ;;  %v3479_v30 = vld [vmem:[#allocation2 + $0xe0] ss:$16 sps:$4 sm:$0xff]   ;;  %v3480_v31 = vld [vmem:[#allocation2 + $0xe8] ss:$16 sps:$4 sm:$0xff]  }
  0x41   :  { %1297 = vmatprep.subr.bf16.mxu0 %v3451_v12  ;;  %1469 = vmatprep.subr.bf16.mxu1 %v3453_v13  ;;  %v3481_v32 = vld [vmem:[#allocation2 + $0x104] ss:$16 sps:$4 sm:$0xff]   ;;  %v3483_v33 = vld [vmem:[#allocation2 + $0x10c] ss:$16 sps:$4 sm:$0xff]   ;;  %v3485_v34 = vld [vmem:[#allocation2 + $0x100] ss:$16 sps:$4 sm:$0xff]  }
  0x42   :  { %v3486_v35 = vld [vmem:[#allocation2 + $0x108] ss:$16 sps:$4 sm:$0xff]   ;;  %v3487_v36 = vld [vmem:[#allocation2 + $0x124] ss:$16 sps:$4 sm:$0xff]   ;;  %v3489_v37 = vld [vmem:[#allocation2 + $0x12c] ss:$16 sps:$4 sm:$0xff]  }
  0x43   :  { %v3491_v38 = vld [vmem:[#allocation2 + $0x120] ss:$16 sps:$4 sm:$0xff]   ;;  %v3492_v39 = vld [vmem:[#allocation2 + $0x128] ss:$16 sps:$4 sm:$0xff]   ;;  %v3493_v40 = vld [vmem:[#allocation2 + $0x144] ss:$16 sps:$4 sm:$0xff]  }
  0x44   :  { %1298 = vmatpush1.bf16.msra.mxu0 %v3455_v14  ;;  %1470 = vmatpush1.bf16.msra.mxu1 %v3456_v15  ;;  %v3495_v41 = vld [vmem:[#allocation2 + $0x14c] ss:$16 sps:$4 sm:$0xff]   ;;  %v3497_v42 = vld [vmem:[#allocation2 + $0x140] ss:$16 sps:$4 sm:$0xff]   ;;  %v3498_v43 = vld [vmem:[#allocation2 + $0x148] ss:$16 sps:$4 sm:$0xff]  }
  0x45   :  { %1299 = vmatprep.subr.bf16.mxu0 %v3457_v16  ;;  %1471 = vmatprep.subr.bf16.mxu1 %v3459_v17  ;;  %v3499_v44 = vld [vmem:[#allocation2 + $0x164] ss:$16 sps:$4 sm:$0xff]   ;;  %v3501_v45 = vld [vmem:[#allocation2 + $0x16c] ss:$16 sps:$4 sm:$0xff]   ;;  %v3503_v48 = vld [vmem:[#allocation2 + $0x160] ss:$16 sps:$4 sm:$0xff]  }
  0x46   :  { %v69_v46 = vld [vmem:[%s4197_s0 + $0x8] sm:$0xff]  ;;  %v76_v47 = vld [vmem:[%s4197_s0 + $0x40] sm:$0xff]  ;;  %v75_v5 = vld [vmem:[%s4197_s0 + $0x38] sm:$0xff]  ;;  %vm1287_vm0 = vcmask 130048  }
  0x47   :  { %v3504_v49 = vld [vmem:[#allocation2 + $0x168] ss:$16 sps:$4 sm:$0xff]   ;;  %v83_v50 = vpack.c.bf16 %v76_v47, %v69_v46  ;;  %v3505_v51 = vld [vmem:[#allocation2 + $0x184] ss:$16 sps:$4 sm:$0xff]   ;;  %v3507_v52 = vld [vmem:[#allocation2 + $0x18c] ss:$16 sps:$4 sm:$0xff]  }
  0x48   :  { %1300 = vmatpush1.bf16.msra.mxu0 %v3461_v18  ;;  %1472 = vmatpush1.bf16.msra.mxu1 %v3462_v19  ;;  %v3509_v53 = vld [vmem:[#allocation2 + $0x180] ss:$16 sps:$4 sm:$0xff]   ;;  %v3510_v54 = vld [vmem:[#allocation2 + $0x188] ss:$16 sps:$4 sm:$0xff]   ;;  %v3511_v55 = vld [vmem:[#allocation2 + $0x1a4] ss:$16 sps:$4 sm:$0xff]  }
  0x49   :  { %1301 = vmatprep.subr.bf16.mxu0 %v3463_v20  ;;  %1473 = vmatprep.subr.bf16.mxu1 %v3465_v21  ;;  %v3513_v56 = vld [vmem:[#allocation2 + $0x1ac] ss:$16 sps:$4 sm:$0xff]   ;;  %v3515_v57 = vld [vmem:[#allocation2 + $0x1a0] ss:$16 sps:$4 sm:$0xff]   ;;  %v3516_v58 = vld [vmem:[#allocation2 + $0x1a8] ss:$16 sps:$4 sm:$0xff]  }
  0x4a   :  { %1323 = vmatprep.mubr.bf16.mxu0 %v83_v50  ;;  %1495 = vmatprep.mubr.bf16.mxu1 %v83_v50  ;;  %v3517_v59 = vld [vmem:[#allocation2 + $0x1c4] ss:$16 sps:$4 sm:$0xff]   ;;  %v3519_v60 = vld [vmem:[#allocation2 + $0x1cc] ss:$16 sps:$4 sm:$0xff]   ;;  %v3521_v61 = vld [vmem:[#allocation2 + $0x1c0] ss:$16 sps:$4 sm:$0xff]  }
  0x4b   :  { %v3522_v62 = vld [vmem:[#allocation2 + $0x1c8] ss:$16 sps:$4 sm:$0xff]   ;;  %v3523_v63 = vld [vmem:[#allocation2 + $0x1e4] ss:$16 sps:$4 sm:$0xff]   ;;  %v3525_v0 = vld [vmem:[#allocation2 + $0x1ec] ss:$16 sps:$4 sm:$0xff]  }
  0x4c   :  { %1302 = vmatpush1.bf16.msra.mxu0 %v3467_v22  ;;  %1474 = vmatpush1.bf16.msra.mxu1 %v3468_v23  ;;  %v3527_v1 = vld [vmem:[#allocation2 + $0x1e0] ss:$16 sps:$4 sm:$0xff]   ;;  %v3528_v2 = vld [vmem:[#allocation2 + $0x1e8] ss:$16 sps:$4 sm:$0xff]   ;;  %v3531_v3 = vld [vmem:[#allocation2 + $0x204] ss:$16 sps:$4 sm:$0xff]  }
  0x4d   :  { %1303 = vmatprep.subr.bf16.mxu0 %v3469_v24  ;;  %1475 = vmatprep.subr.bf16.mxu1 %v3471_v25  ;;  %v68_v4 = vld [vmem:[%s4197_s0] sm:$0xff]  ;;  %v3534_v6 = vld [vmem:[#allocation2 + $0x20c] ss:$16 sps:$4 sm:$0xff]   ;;  %v3532_v8 = vld [vmem:[#allocation2 + $0x208] ss:$16 sps:$4 sm:$0xff]  }
  0x4e   :  { %v3529_v7 = vld [vmem:[#allocation2 + $0x200] ss:$16 sps:$4 sm:$0xff]   ;;  %v82_v9 = vpack.c.bf16 %v75_v5, %v68_v4  ;;  %v3537_v10 = vld [vmem:[#allocation2 + $0x224] ss:$16 sps:$4 sm:$0xff]   ;;  %v3540_v11 = vld [vmem:[#allocation2 + $0x22c] ss:$16 sps:$4 sm:$0xff]  }
  0x4f   :  { %v3535_v12 = vld [vmem:[#allocation2 + $0x220] ss:$16 sps:$4 sm:$0xff]   ;;  %v3538_v13 = vld [vmem:[#allocation2 + $0x228] ss:$16 sps:$4 sm:$0xff]   ;;  %v3543_v14 = vld [vmem:[#allocation2 + $0x244] ss:$16 sps:$4 sm:$0xff]  }
  0x50   :  { %1304 = vmatpush1.bf16.msra.mxu0 %v3473_v26  ;;  %1476 = vmatpush1.bf16.msra.mxu1 %v3474_v27  ;;  %v3546_v15 = vld [vmem:[#allocation2 + $0x24c] ss:$16 sps:$4 sm:$0xff]   ;;  %v3541_v16 = vld [vmem:[#allocation2 + $0x240] ss:$16 sps:$4 sm:$0xff]   ;;  %v3544_v17 = vld [vmem:[#allocation2 + $0x248] ss:$16 sps:$4 sm:$0xff]  }
  0x51   :  { %1305 = vmatprep.subr.bf16.mxu0 %v3475_v28  ;;  %1477 = vmatprep.subr.bf16.mxu1 %v3477_v29  ;;  %v3549_v18 = vld [vmem:[#allocation2 + $0x264] ss:$16 sps:$4 sm:$0xff]   ;;  %v3552_v19 = vld [vmem:[#allocation2 + $0x26c] ss:$16 sps:$4 sm:$0xff]   ;;  %v3547_v20 = vld [vmem:[#allocation2 + $0x260] ss:$16 sps:$4 sm:$0xff]  }
  0x52   :  { %v3550_v21 = vld [vmem:[#allocation2 + $0x268] ss:$16 sps:$4 sm:$0xff]   ;;  %v3555_v22 = vld [vmem:[#allocation2 + $0x284] ss:$16 sps:$4 sm:$0xff]   ;;  %v3558_v23 = vld [vmem:[#allocation2 + $0x28c] ss:$16 sps:$4 sm:$0xff]  }
  0x53   :  { %v3553_v24 = vld [vmem:[#allocation2 + $0x280] ss:$16 sps:$4 sm:$0xff]   ;;  %v3556_v25 = vld [vmem:[#allocation2 + $0x288] ss:$16 sps:$4 sm:$0xff]   ;;  %v3561_v26 = vld [vmem:[#allocation2 + $0x2a4] ss:$16 sps:$4 sm:$0xff]  }
  0x54   :  { %1306 = vmatpush1.bf16.msra.mxu0 %v3479_v30  ;;  %1478 = vmatpush1.bf16.msra.mxu1 %v3480_v31  ;;  %v3564_v27 = vld [vmem:[#allocation2 + $0x2ac] ss:$16 sps:$4 sm:$0xff]   ;;  %v3559_v28 = vld [vmem:[#allocation2 + $0x2a0] ss:$16 sps:$4 sm:$0xff]   ;;  %v3562_v29 = vld [vmem:[#allocation2 + $0x2a8] ss:$16 sps:$4 sm:$0xff]  }
  0x55   :  { %1307 = vmatprep.subr.bf16.mxu0 %v3481_v32  ;;  %1479 = vmatprep.subr.bf16.mxu1 %v3483_v33  ;;  %v3567_v30 = vld [vmem:[#allocation2 + $0x2c4] ss:$16 sps:$4 sm:$0xff]   ;;  %v3570_v31 = vld [vmem:[#allocation2 + $0x2cc] ss:$16 sps:$4 sm:$0xff]   ;;  %v3583_v47 = vld [vmem:[#allocation2 + $0x320] ss:$16 sps:$4 sm:$0xff]  }
  0x56   :  { %v71_v32 = vld [vmem:[%s4197_s0 + $0x18] sm:$0xff]  ;;  %v78_v33 = vld [vmem:[%s4197_s0 + $0x50] sm:$0xff] }
  0x57   :  { %v3588_v46 = vld [vmem:[#allocation2 + $0x32c] ss:$16 sps:$4 sm:$0xff]   ;;  %v3616_v4 = vld [vmem:[#allocation2 + $0x3c8] ss:$16 sps:$4 sm:$0xff]   ;;  %v3621_v5 = vld [vmem:[#allocation2 + $0x3e4] ss:$16 sps:$4 sm:$0xff]  }
  0x58   :  { %1308 = vmatpush1.bf16.msra.mxu0 %v3485_v34  ;;  %1480 = vmatpush1.bf16.msra.mxu1 %v3486_v35  ;;  %v3565_v34 = vld [vmem:[#allocation2 + $0x2c0] ss:$16 sps:$4 sm:$0xff]   ;;  %v3568_v35 = vld [vmem:[#allocation2 + $0x2c8] ss:$16 sps:$4 sm:$0xff]   ;;  %v3594_v50 = vld [vmem:[#allocation2 + $0x34c] ss:$16 sps:$4 sm:$0xff]  }
  0x59   :  { %1309 = vmatprep.subr.bf16.mxu0 %v3487_v36  ;;  %1481 = vmatprep.subr.bf16.mxu1 %v3489_v37  ;;  %v85_v36 = vpack.c.bf16 %v78_v33, %v71_v32  ;;  %v3573_v37 = vld [vmem:[#allocation2 + $0x2e4] ss:$16 sps:$4 sm:$0xff]   ;;  %v3654_v32 = vld [vmem:[#allocation2 + $0x48c] ss:$16 sps:$4 sm:$0xff]   ;;  %v3649_v33 = vld [vmem:[#allocation2 + $0x480] ss:$16 sps:$4 sm:$0xff]  }
  0x5c   :  { %1310 = vmatpush1.bf16.msra.mxu0 %v3491_v38  ;;  %1482 = vmatpush1.bf16.msra.mxu1 %v3492_v39  ;;  %v3576_v38 = vld [vmem:[#allocation2 + $0x2ec] ss:$16 sps:$4 sm:$0xff]   ;;  %v3571_v39 = vld [vmem:[#allocation2 + $0x2e0] ss:$16 sps:$4 sm:$0xff]  }
  0x5d   :  { %1311 = vmatprep.subr.bf16.mxu0 %v3493_v40  ;;  %1483 = vmatprep.subr.bf16.mxu1 %v3495_v41  ;;  %v3574_v40 = vld [vmem:[#allocation2 + $0x2e8] ss:$16 sps:$4 sm:$0xff]   ;;  %v3579_v41 = vld [vmem:[#allocation2 + $0x304] ss:$16 sps:$4 sm:$0xff]  }
  0x60   :  { %1312 = vmatpush1.bf16.msra.mxu0 %v3497_v42  ;;  %1484 = vmatpush1.bf16.msra.mxu1 %v3498_v43  ;;  %v3582_v42 = vld [vmem:[#allocation2 + $0x30c] ss:$16 sps:$4 sm:$0xff]   ;;  %v3577_v43 = vld [vmem:[#allocation2 + $0x300] ss:$16 sps:$4 sm:$0xff]  }
  0x61   :  { %1313 = vmatprep.subr.bf16.mxu0 %v3499_v44  ;;  %1485 = vmatprep.subr.bf16.mxu1 %v3501_v45  ;;  %v3580_v44 = vld [vmem:[#allocation2 + $0x308] ss:$16 sps:$4 sm:$0xff]   ;;  %v3585_v45 = vld [vmem:[#allocation2 + $0x324] ss:$16 sps:$4 sm:$0xff]  }
  0x64   :  { %1314 = vmatpush1.bf16.msra.mxu0 %v3503_v48  ;;  %1486 = vmatpush1.bf16.msra.mxu1 %v3504_v49  ;;  %v3586_v48 = vld [vmem:[#allocation2 + $0x328] ss:$16 sps:$4 sm:$0xff]   ;;  %v3591_v49 = vld [vmem:[#allocation2 + $0x344] ss:$16 sps:$4 sm:$0xff]  }
  0x65   :  { %1315 = vmatprep.subr.bf16.mxu0 %v3505_v51  ;;  %1487 = vmatprep.subr.bf16.mxu1 %v3507_v52  ;;  %v3589_v51 = vld [vmem:[#allocation2 + $0x340] ss:$16 sps:$4 sm:$0xff]   ;;  %v3592_v52 = vld [vmem:[#allocation2 + $0x348] ss:$16 sps:$4 sm:$0xff]  }
  0x68   :  { %1316 = vmatpush1.bf16.msra.mxu0 %v3509_v53  ;;  %1488 = vmatpush1.bf16.msra.mxu1 %v3510_v54  ;;  %v3597_v53 = vld [vmem:[#allocation2 + $0x364] ss:$16 sps:$4 sm:$0xff]   ;;  %v3600_v54 = vld [vmem:[#allocation2 + $0x36c] ss:$16 sps:$4 sm:$0xff]  }
  0x69   :  { %1317 = vmatprep.subr.bf16.mxu0 %v3511_v55  ;;  %1489 = vmatprep.subr.bf16.mxu1 %v3513_v56  ;;  %v3595_v55 = vld [vmem:[#allocation2 + $0x360] ss:$16 sps:$4 sm:$0xff]   ;;  %v3598_v56 = vld [vmem:[#allocation2 + $0x368] ss:$16 sps:$4 sm:$0xff]  }
  0x6c   :  { %1318 = vmatpush1.bf16.msra.mxu0 %v3515_v57  ;;  %1490 = vmatpush1.bf16.msra.mxu1 %v3516_v58  ;;  %v3603_v57 = vld [vmem:[#allocation2 + $0x384] ss:$16 sps:$4 sm:$0xff]   ;;  %v3606_v58 = vld [vmem:[#allocation2 + $0x38c] ss:$16 sps:$4 sm:$0xff]  }
  0x6d   :  { %1319 = vmatprep.subr.bf16.mxu0 %v3517_v59  ;;  %1491 = vmatprep.subr.bf16.mxu1 %v3519_v60  ;;  %v3601_v59 = vld [vmem:[#allocation2 + $0x380] ss:$16 sps:$4 sm:$0xff]   ;;  %v3604_v60 = vld [vmem:[#allocation2 + $0x388] ss:$16 sps:$4 sm:$0xff]  }
  0x70   :  { %1320 = vmatpush1.bf16.msra.mxu0 %v3521_v61  ;;  %1492 = vmatpush1.bf16.msra.mxu1 %v3522_v62  ;;  %v3609_v61 = vld [vmem:[#allocation2 + $0x3a4] ss:$16 sps:$4 sm:$0xff]   ;;  %v3612_v62 = vld [vmem:[#allocation2 + $0x3ac] ss:$16 sps:$4 sm:$0xff]  }
  0x71   :  { %1321 = vmatprep.subr.bf16.mxu0 %v3523_v63  ;;  %1493 = vmatprep.subr.bf16.mxu1 %v3525_v0  ;;  %v3607_v63 = vld [vmem:[#allocation2 + $0x3a0] ss:$16 sps:$4 sm:$0xff]   ;;  %v3610_v0 = vld [vmem:[#allocation2 + $0x3a8] ss:$16 sps:$4 sm:$0xff]  }
  0x74   :  { %1322 = vmatpush1.bf16.msra.mxu0 %v3527_v1  ;;  %1494 = vmatpush1.bf16.msra.mxu1 %v3528_v2  ;;  %v3615_v1 = vld [vmem:[#allocation2 + $0x3c4] ss:$16 sps:$4 sm:$0xff]   ;;  %v3618_v2 = vld [vmem:[#allocation2 + $0x3cc] ss:$16 sps:$4 sm:$0xff]  }
  0x75   :  { %1334 = vmatprep.subr.bf16.mxu0 %v3531_v3  ;;  %1506 = vmatprep.subr.bf16.mxu1 %v3534_v6  ;;  %v3613_v3 = vld [vmem:[#allocation2 + $0x3c0] ss:$16 sps:$4 sm:$0xff]   ;;  %v3624_v6 = vld [vmem:[#allocation2 + $0x3ec] ss:$16 sps:$4 sm:$0xff]  }
  0x77   :  { %1324 = vmatmul.mubr.bf16.vlgmr.msra.gmra.mrb[0].mxu0 %v82_v9  ;;  %1496 = vmatmul.mubr.bf16.vlgmr.msra.gmra.mrb[0].mxu1 %v82_v9  ;;  %v3627_v9 = vld [vmem:[#allocation2 + $0x404] ss:$16 sps:$4 sm:$0xff]  }
  0x78   :  { %1335 = vmatpush1.bf16.msra.mxu0 %v3529_v7  ;;  %1507 = vmatpush1.bf16.msra.mxu1 %v3532_v8  ;;  %v3619_v7 = vld [vmem:[#allocation2 + $0x3e0] ss:$16 sps:$4 sm:$0xff]   ;;  %v3622_v8 = vld [vmem:[#allocation2 + $0x3e8] ss:$16 sps:$4 sm:$0xff]  }
  0x79   :  { %1336 = vmatprep.subr.bf16.mxu0 %v3537_v10  ;;  %1508 = vmatprep.subr.bf16.mxu1 %v3540_v11  ;;  %v70_v10 = vld [vmem:[%s4197_s0 + $0x10] sm:$0xff]  ;;  %v77_v11 = vld [vmem:[%s4197_s0 + $0x48] sm:$0xff] }
  0x7a   :  { %1366 = vmatprep.mubr.bf16.mxu0 %v85_v36  ;;  %1538 = vmatprep.mubr.bf16.mxu1 %v85_v36  ;;  %v3660_v36 = vld [vmem:[#allocation2 + $0x4ac] ss:$16 sps:$4 sm:$0xff]  }
  0x7c   :  { %1337 = vmatpush1.bf16.msra.mxu0 %v3535_v12  ;;  %1509 = vmatpush1.bf16.msra.mxu1 %v3538_v13  ;;  %v3630_v12 = vld [vmem:[#allocation2 + $0x40c] ss:$16 sps:$4 sm:$0xff]   ;;  %v3625_v13 = vld [vmem:[#allocation2 + $0x400] ss:$16 sps:$4 sm:$0xff]  }
  0x7d   :  { %1338 = vmatprep.subr.bf16.mxu0 %v3543_v14  ;;  %1510 = vmatprep.subr.bf16.mxu1 %v3546_v15  ;;  %v3628_v14 = vld [vmem:[#allocation2 + $0x408] ss:$16 sps:$4 sm:$0xff]   ;;  %v84_v15 = vpack.c.bf16 %v77_v11, %v70_v10  ;;  %v3717_v11 = vld [vmem:[#allocation2 + $0x5e4] ss:$16 sps:$4 sm:$0xff]  }
  0x7e   :  { %v3712_v10 = vld [vmem:[#allocation2 + $0x5c8] ss:$16 sps:$4 sm:$0xff]  }
  0x80   :  { %1339 = vmatpush1.bf16.msra.mxu0 %v3541_v16  ;;  %1511 = vmatpush1.bf16.msra.mxu1 %v3544_v17  ;;  %v3633_v16 = vld [vmem:[#allocation2 + $0x424] ss:$16 sps:$4 sm:$0xff]   ;;  %v3636_v17 = vld [vmem:[#allocation2 + $0x42c] ss:$16 sps:$4 sm:$0xff]  }
  0x81   :  { %1340 = vmatprep.subr.bf16.mxu0 %v3549_v18  ;;  %1512 = vmatprep.subr.bf16.mxu1 %v3552_v19  ;;  %v73_v18 = vld [vmem:[%s4197_s0 + $0x28] sm:$0xff]  ;;  %v3631_v19 = vld [vmem:[#allocation2 + $0x420] ss:$16 sps:$4 sm:$0xff]  }
  0x84   :  { %1341 = vmatpush1.bf16.msra.mxu0 %v3547_v20  ;;  %1513 = vmatpush1.bf16.msra.mxu1 %v3550_v21  ;;  %v3634_v20 = vld [vmem:[#allocation2 + $0x428] ss:$16 sps:$4 sm:$0xff]   ;;  %v80_v21 = vld [vmem:[%s4197_s0 + $0x60] sm:$0xff] }
  0x85   :  { %1342 = vmatprep.subr.bf16.mxu0 %v3555_v22  ;;  %1514 = vmatprep.subr.bf16.mxu1 %v3558_v23  ;;  %v3639_v22 = vld [vmem:[#allocation2 + $0x444] ss:$16 sps:$4 sm:$0xff]   ;;  %v87_v23 = vpack.c.bf16 %v80_v21, %v73_v18  ;;  %v3726_v18 = vld [vmem:[#allocation2 + $0x60c] ss:$16 sps:$4 sm:$0xff]  }
  0x88   :  { %1343 = vmatpush1.bf16.msra.mxu0 %v3553_v24  ;;  %1515 = vmatpush1.bf16.msra.mxu1 %v3556_v25  ;;  %v3642_v24 = vld [vmem:[#allocation2 + $0x44c] ss:$16 sps:$4 sm:$0xff]   ;;  %v3637_v25 = vld [vmem:[#allocation2 + $0x440] ss:$16 sps:$4 sm:$0xff]  }
  0x89   :  { %1344 = vmatprep.subr.bf16.mxu0 %v3561_v26  ;;  %1516 = vmatprep.subr.bf16.mxu1 %v3564_v27  ;;  %v3640_v26 = vld [vmem:[#allocation2 + $0x448] ss:$16 sps:$4 sm:$0xff]   ;;  %v3645_v27 = vld [vmem:[#allocation2 + $0x464] ss:$16 sps:$4 sm:$0xff]  }
  0x8c   :  { %1345 = vmatpush1.bf16.msra.mxu0 %v3559_v28  ;;  %1517 = vmatpush1.bf16.msra.mxu1 %v3562_v29  ;;  %v3648_v28 = vld [vmem:[#allocation2 + $0x46c] ss:$16 sps:$4 sm:$0xff]   ;;  %v3643_v29 = vld [vmem:[#allocation2 + $0x460] ss:$16 sps:$4 sm:$0xff]  }
  0x8d   :  { %1346 = vmatprep.subr.bf16.mxu0 %v3567_v30  ;;  %1518 = vmatprep.subr.bf16.mxu1 %v3570_v31  ;;  %v3646_v30 = vld [vmem:[#allocation2 + $0x468] ss:$16 sps:$4 sm:$0xff]   ;;  %v3651_v31 = vld [vmem:[#allocation2 + $0x484] ss:$16 sps:$4 sm:$0xff]  }
  0x90   :  { %1347 = vmatpush1.bf16.msra.mxu0 %v3565_v34  ;;  %1519 = vmatpush1.bf16.msra.mxu1 %v3568_v35  ;;  %v3652_v34 = vld [vmem:[#allocation2 + $0x488] ss:$16 sps:$4 sm:$0xff]   ;;  %v3657_v35 = vld [vmem:[#allocation2 + $0x4a4] ss:$16 sps:$4 sm:$0xff]  }
  0x91   :  { %1348 = vmatprep.subr.bf16.mxu0 %v3573_v37  ;;  %1520 = vmatprep.subr.bf16.mxu1 %v3576_v38  ;;  %v3655_v37 = vld [vmem:[#allocation2 + $0x4a0] ss:$16 sps:$4 sm:$0xff]   ;;  %v3658_v38 = vld [vmem:[#allocation2 + $0x4a8] ss:$16 sps:$4 sm:$0xff]  }
  0x94   :  { %1349 = vmatpush1.bf16.msra.mxu0 %v3571_v39  ;;  %1521 = vmatpush1.bf16.msra.mxu1 %v3574_v40  ;;  %v3663_v39 = vld [vmem:[#allocation2 + $0x4c4] ss:$16 sps:$4 sm:$0xff]   ;;  %v3666_v40 = vld [vmem:[#allocation2 + $0x4cc] ss:$16 sps:$4 sm:$0xff]  }
  0x95   :  { %1350 = vmatprep.subr.bf16.mxu0 %v3579_v41  ;;  %1522 = vmatprep.subr.bf16.mxu1 %v3582_v42  ;;  %v3661_v41 = vld [vmem:[#allocation2 + $0x4c0] ss:$16 sps:$4 sm:$0xff]   ;;  %v3664_v42 = vld [vmem:[#allocation2 + $0x4c8] ss:$16 sps:$4 sm:$0xff]  }
  0x98   :  { %1351 = vmatpush1.bf16.msra.mxu0 %v3577_v43  ;;  %1523 = vmatpush1.bf16.msra.mxu1 %v3580_v44  ;;  %v3669_v43 = vld [vmem:[#allocation2 + $0x4e4] ss:$16 sps:$4 sm:$0xff]   ;;  %v3672_v44 = vld [vmem:[#allocation2 + $0x4ec] ss:$16 sps:$4 sm:$0xff]  }
  0x99   :  { %1352 = vmatprep.subr.bf16.mxu0 %v3585_v45  ;;  %1524 = vmatprep.subr.bf16.mxu1 %v3588_v46  ;;  %v3667_v45 = vld [vmem:[#allocation2 + $0x4e0] ss:$16 sps:$4 sm:$0xff]   ;;  %v3670_v46 = vld [vmem:[#allocation2 + $0x4e8] ss:$16 sps:$4 sm:$0xff]  }
  0x9c   :  { %1353 = vmatpush1.bf16.msra.mxu0 %v3583_v47  ;;  %1525 = vmatpush1.bf16.msra.mxu1 %v3586_v48  ;;  %v3675_v47 = vld [vmem:[#allocation2 + $0x504] ss:$16 sps:$4 sm:$0xff]   ;;  %v3678_v48 = vld [vmem:[#allocation2 + $0x50c] ss:$16 sps:$4 sm:$0xff]  }
  0x9d   :  { %1354 = vmatprep.subr.bf16.mxu0 %v3591_v49  ;;  %1526 = vmatprep.subr.bf16.mxu1 %v3594_v50  ;;  %v3673_v49 = vld [vmem:[#allocation2 + $0x500] ss:$16 sps:$4 sm:$0xff]   ;;  %v3676_v50 = vld [vmem:[#allocation2 + $0x508] ss:$16 sps:$4 sm:$0xff]  }
  0xa0   :  { %1355 = vmatpush1.bf16.msra.mxu0 %v3589_v51  ;;  %1527 = vmatpush1.bf16.msra.mxu1 %v3592_v52  ;;  %v3681_v51 = vld [vmem:[#allocation2 + $0x524] ss:$16 sps:$4 sm:$0xff]   ;;  %v3684_v52 = vld [vmem:[#allocation2 + $0x52c] ss:$16 sps:$4 sm:$0xff]  }
  0xa1   :  { %1356 = vmatprep.subr.bf16.mxu0 %v3597_v53  ;;  %1528 = vmatprep.subr.bf16.mxu1 %v3600_v54  ;;  %v3679_v53 = vld [vmem:[#allocation2 + $0x520] ss:$16 sps:$4 sm:$0xff]   ;;  %v3682_v54 = vld [vmem:[#allocation2 + $0x528] ss:$16 sps:$4 sm:$0xff]  }
  0xa4   :  { %1357 = vmatpush1.bf16.msra.mxu0 %v3595_v55  ;;  %1529 = vmatpush1.bf16.msra.mxu1 %v3598_v56  ;;  %v3687_v55 = vld [vmem:[#allocation2 + $0x544] ss:$16 sps:$4 sm:$0xff]   ;;  %v3690_v56 = vld [vmem:[#allocation2 + $0x54c] ss:$16 sps:$4 sm:$0xff]  }
  0xa5   :  { %1358 = vmatprep.subr.bf16.mxu0 %v3603_v57  ;;  %1530 = vmatprep.subr.bf16.mxu1 %v3606_v58  ;;  %v3685_v57 = vld [vmem:[#allocation2 + $0x540] ss:$16 sps:$4 sm:$0xff]   ;;  %v3688_v58 = vld [vmem:[#allocation2 + $0x548] ss:$16 sps:$4 sm:$0xff]  }
  0xa8   :  { %1359 = vmatpush1.bf16.msra.mxu0 %v3601_v59  ;;  %1531 = vmatpush1.bf16.msra.mxu1 %v3604_v60  ;;  %v3693_v59 = vld [vmem:[#allocation2 + $0x564] ss:$16 sps:$4 sm:$0xff]   ;;  %v3696_v60 = vld [vmem:[#allocation2 + $0x56c] ss:$16 sps:$4 sm:$0xff]  }
  0xa9   :  { %1360 = vmatprep.subr.bf16.mxu0 %v3609_v61  ;;  %1532 = vmatprep.subr.bf16.mxu1 %v3612_v62  ;;  %v3691_v61 = vld [vmem:[#allocation2 + $0x560] ss:$16 sps:$4 sm:$0xff]   ;;  %v3694_v62 = vld [vmem:[#allocation2 + $0x568] ss:$16 sps:$4 sm:$0xff]  }
  0xac   :  { %1361 = vmatpush1.bf16.msra.mxu0 %v3607_v63  ;;  %1533 = vmatpush1.bf16.msra.mxu1 %v3610_v0  ;;  %v3699_v63 = vld [vmem:[#allocation2 + $0x584] ss:$16 sps:$4 sm:$0xff]   ;;  %v3702_v0 = vld [vmem:[#allocation2 + $0x58c] ss:$16 sps:$4 sm:$0xff]  }
  0xad   :  { %1362 = vmatprep.subr.bf16.mxu0 %v3615_v1  ;;  %1534 = vmatprep.subr.bf16.mxu1 %v3618_v2  ;;  %v3697_v1 = vld [vmem:[#allocation2 + $0x580] ss:$16 sps:$4 sm:$0xff]   ;;  %v3700_v2 = vld [vmem:[#allocation2 + $0x588] ss:$16 sps:$4 sm:$0xff]  }
  0xb0   :  { %1363 = vmatpush1.bf16.msra.mxu0 %v3613_v3  ;;  %1535 = vmatpush1.bf16.msra.mxu1 %v3616_v4  ;;  %v3705_v3 = vld [vmem:[#allocation2 + $0x5a4] ss:$16 sps:$4 sm:$0xff]   ;;  %v3708_v4 = vld [vmem:[#allocation2 + $0x5ac] ss:$16 sps:$4 sm:$0xff]  }
  0xb1   :  { %1364 = vmatprep.subr.bf16.mxu0 %v3621_v5  ;;  %1536 = vmatprep.subr.bf16.mxu1 %v3624_v6  ;;  %v3703_v5 = vld [vmem:[#allocation2 + $0x5a0] ss:$16 sps:$4 sm:$0xff]   ;;  %v3706_v6 = vld [vmem:[#allocation2 + $0x5a8] ss:$16 sps:$4 sm:$0xff]  }
  0xb4   :  { %1365 = vmatpush1.bf16.msra.mxu0 %v3619_v7  ;;  %1537 = vmatpush1.bf16.msra.mxu1 %v3622_v8  ;;  %v3711_v7 = vld [vmem:[#allocation2 + $0x5c4] ss:$16 sps:$4 sm:$0xff]   ;;  %v3714_v8 = vld [vmem:[#allocation2 + $0x5cc] ss:$16 sps:$4 sm:$0xff]  }
  0xb5   :  { %1377 = vmatprep.subr.bf16.mxu0 %v3627_v9  ;;  %1549 = vmatprep.subr.bf16.mxu1 %v3630_v12  ;;  %v3709_v9 = vld [vmem:[#allocation2 + $0x5c0] ss:$16 sps:$4 sm:$0xff]   ;;  %v3720_v12 = vld [vmem:[#allocation2 + $0x5ec] ss:$16 sps:$4 sm:$0xff]  }
  0xb7   :  { %1367 = vmatmul.mubr.bf16.vlgmr.msra.gmra.mrb[0].mxu0 %v84_v15  ;;  %1539 = vmatmul.mubr.bf16.vlgmr.msra.gmra.mrb[0].mxu1 %v84_v15  ;;  %v72_v15 = vld [vmem:[%s4197_s0 + $0x20] sm:$0xff] }
  0xb8   :  { %1378 = vmatpush1.bf16.msra.mxu0 %v3625_v13  ;;  %1550 = vmatpush1.bf16.msra.mxu1 %v3628_v14  ;;  %v3715_v13 = vld [vmem:[#allocation2 + $0x5e0] ss:$16 sps:$4 sm:$0xff]   ;;  %v3718_v14 = vld [vmem:[#allocation2 + $0x5e8] ss:$16 sps:$4 sm:$0xff]  }
  0xb9   :  { %1379 = vmatprep.subr.bf16.mxu0 %v3633_v16  ;;  %1551 = vmatprep.subr.bf16.mxu1 %v3636_v17  ;;  %v79_v16 = vld [vmem:[%s4197_s0 + $0x58] sm:$0xff]  ;;  %v3723_v17 = vld [vmem:[#allocation2 + $0x604] ss:$16 sps:$4 sm:$0xff]  }
  0xba   :  { %1409 = vmatprep.mubr.bf16.mxu0 %v87_v23  ;;  %1581 = vmatprep.mubr.bf16.mxu1 %v87_v23  ;;  %v86_v21 = vpack.c.bf16 %v79_v16, %v72_v15  ;;  %v3732_v23 = vld [vmem:[#allocation4 + $0xc] ss:$16 sps:$4 sm:$0xff]   ;;  %v3805_v16 = vld [vmem:[#allocation4 + $0x1a0] ss:$16 sps:$4 sm:$0xff]  }
  0xbb   :  { %v3810_v15 = vld [vmem:[#allocation4 + $0x1ac] ss:$16 sps:$4 sm:$0xff]  }
  0xbc   :  { %1380 = vmatpush1.bf16.msra.mxu0 %v3631_v19  ;;  %1552 = vmatpush1.bf16.msra.mxu1 %v3634_v20  ;;  %v3721_v19 = vld [vmem:[#allocation2 + $0x600] ss:$16 sps:$4 sm:$0xff]   ;;  %v3724_v20 = vld [vmem:[#allocation2 + $0x608] ss:$16 sps:$4 sm:$0xff]  }
  0xbd   :  { %1381 = vmatprep.subr.bf16.mxu0 %v3639_v22  ;;  %1553 = vmatprep.subr.bf16.mxu1 %v3642_v24  ;;  %v3729_v22 = vld [vmem:[#allocation4 + $0x4] ss:$16 sps:$4 sm:$0xff]   ;;  %v4028_v24 = vmov 0  }
  0xc0   :  { %1382 = vmatpush1.bf16.msra.mxu0 %v3637_v25  ;;  %1554 = vmatpush1.bf16.msra.mxu1 %v3640_v26  ;;  %v74_v25 = vld [vmem:[%s4197_s0 + $0x30] sm:$0xff]  ;;  %v81_v26 = vld [vmem:[%s4197_s0 + $0x68] sm:$0xff] }
  0xc1   :  { %1383 = vmatprep.subr.bf16.mxu0 %v3645_v27  ;;  %1555 = vmatprep.subr.bf16.mxu1 %v3648_v28  ;;  %v3727_v27 = vld [vmem:[#allocation4] ss:$16 sps:$4 sm:$0xff]   ;;  %v3730_v28 = vld [vmem:[#allocation4 + $0x8] ss:$16 sps:$4 sm:$0xff]  }
  0xc4   :  { %1384 = vmatpush1.bf16.msra.mxu0 %v3643_v29  ;;  %1556 = vmatpush1.bf16.msra.mxu1 %v3646_v30  ;;  %v88_v29 = vpack.c.bf16 %v81_v26, %v74_v25  ;;  %v3735_v30 = vld [vmem:[#allocation4 + $0x24] ss:$16 sps:$4 sm:$0xff]   ;;  %v3820_v25 = vld [vmem:[#allocation4 + $0x1e8] ss:$16 sps:$4 sm:$0xff]  }
  0xc5   :  { %1385 = vmatprep.subr.bf16.mxu0 %v3651_v31  ;;  %1557 = vmatprep.subr.bf16.mxu1 %v3654_v32  ;;  %v3738_v31 = vld [vmem:[#allocation4 + $0x2c] ss:$16 sps:$4 sm:$0xff]   ;;  %v3733_v32 = vld [vmem:[#allocation4 + $0x20] ss:$16 sps:$4 sm:$0xff]   ;;  %v3825_v26 = vld [vmem:[#allocation4 + $0x204] ss:$16 sps:$4 sm:$0xff]  }
  0xc8   :  { %1386 = vmatpush1.bf16.msra.mxu0 %v3649_v33  ;;  %1558 = vmatpush1.bf16.msra.mxu1 %v3652_v34  ;;  %v3736_v33 = vld [vmem:[#allocation4 + $0x28] ss:$16 sps:$4 sm:$0xff]   ;;  %v3741_v34 = vld [vmem:[#allocation4 + $0x44] ss:$16 sps:$4 sm:$0xff]  }
  0xc9   :  { %1387 = vmatprep.subr.bf16.mxu0 %v3657_v35  ;;  %1559 = vmatprep.subr.bf16.mxu1 %v3660_v36  ;;  %v3744_v35 = vld [vmem:[#allocation4 + $0x4c] ss:$16 sps:$4 sm:$0xff]   ;;  %v3739_v36 = vld [vmem:[#allocation4 + $0x40] ss:$16 sps:$4 sm:$0xff]  }
  0xcc   :  { %1388 = vmatpush1.bf16.msra.mxu0 %v3655_v37  ;;  %1560 = vmatpush1.bf16.msra.mxu1 %v3658_v38  ;;  %v3742_v37 = vld [vmem:[#allocation4 + $0x48] ss:$16 sps:$4 sm:$0xff]   ;;  %v3747_v38 = vld [vmem:[#allocation4 + $0x64] ss:$16 sps:$4 sm:$0xff]  }
  0xcd   :  { %1389 = vmatprep.subr.bf16.mxu0 %v3663_v39  ;;  %1561 = vmatprep.subr.bf16.mxu1 %v3666_v40  ;;  %v3750_v39 = vld [vmem:[#allocation4 + $0x6c] ss:$16 sps:$4 sm:$0xff]   ;;  %v3745_v40 = vld [vmem:[#allocation4 + $0x60] ss:$16 sps:$4 sm:$0xff]  }
  0xd0   :  { %1390 = vmatpush1.bf16.msra.mxu0 %v3661_v41  ;;  %1562 = vmatpush1.bf16.msra.mxu1 %v3664_v42  ;;  %v3748_v41 = vld [vmem:[#allocation4 + $0x68] ss:$16 sps:$4 sm:$0xff]   ;;  %v3753_v42 = vld [vmem:[#allocation4 + $0x84] ss:$16 sps:$4 sm:$0xff]  }
  0xd1   :  { %1391 = vmatprep.subr.bf16.mxu0 %v3669_v43  ;;  %1563 = vmatprep.subr.bf16.mxu1 %v3672_v44  ;;  %v3756_v43 = vld [vmem:[#allocation4 + $0x8c] ss:$16 sps:$4 sm:$0xff]   ;;  %v3751_v44 = vld [vmem:[#allocation4 + $0x80] ss:$16 sps:$4 sm:$0xff]  }
  0xd4   :  { %1392 = vmatpush1.bf16.msra.mxu0 %v3667_v45  ;;  %1564 = vmatpush1.bf16.msra.mxu1 %v3670_v46  ;;  %v3754_v45 = vld [vmem:[#allocation4 + $0x88] ss:$16 sps:$4 sm:$0xff]   ;;  %v3759_v46 = vld [vmem:[#allocation4 + $0xa4] ss:$16 sps:$4 sm:$0xff]  }
  0xd5   :  { %1393 = vmatprep.subr.bf16.mxu0 %v3675_v47  ;;  %1565 = vmatprep.subr.bf16.mxu1 %v3678_v48  ;;  %v3762_v47 = vld [vmem:[#allocation4 + $0xac] ss:$16 sps:$4 sm:$0xff]   ;;  %v3757_v48 = vld [vmem:[#allocation4 + $0xa0] ss:$16 sps:$4 sm:$0xff]  }
  0xd8   :  { %1394 = vmatpush1.bf16.msra.mxu0 %v3673_v49  ;;  %1566 = vmatpush1.bf16.msra.mxu1 %v3676_v50  ;;  %v3760_v49 = vld [vmem:[#allocation4 + $0xa8] ss:$16 sps:$4 sm:$0xff]   ;;  %v3765_v50 = vld [vmem:[#allocation4 + $0xc4] ss:$16 sps:$4 sm:$0xff]  }
  0xd9   :  { %1395 = vmatprep.subr.bf16.mxu0 %v3681_v51  ;;  %1567 = vmatprep.subr.bf16.mxu1 %v3684_v52  ;;  %v3768_v51 = vld [vmem:[#allocation4 + $0xcc] ss:$16 sps:$4 sm:$0xff]   ;;  %v3763_v52 = vld [vmem:[#allocation4 + $0xc0] ss:$16 sps:$4 sm:$0xff]  }
  0xdc   :  { %1396 = vmatpush1.bf16.msra.mxu0 %v3679_v53  ;;  %1568 = vmatpush1.bf16.msra.mxu1 %v3682_v54  ;;  %v3766_v53 = vld [vmem:[#allocation4 + $0xc8] ss:$16 sps:$4 sm:$0xff]   ;;  %v3771_v54 = vld [vmem:[#allocation4 + $0xe4] ss:$16 sps:$4 sm:$0xff]  }
  0xdd   :  { %1397 = vmatprep.subr.bf16.mxu0 %v3687_v55  ;;  %1569 = vmatprep.subr.bf16.mxu1 %v3690_v56  ;;  %v3774_v55 = vld [vmem:[#allocation4 + $0xec] ss:$16 sps:$4 sm:$0xff]   ;;  %v3769_v56 = vld [vmem:[#allocation4 + $0xe0] ss:$16 sps:$4 sm:$0xff]  }
  0xe0   :  { %1398 = vmatpush1.bf16.msra.mxu0 %v3685_v57  ;;  %1570 = vmatpush1.bf16.msra.mxu1 %v3688_v58  ;;  %v3772_v57 = vld [vmem:[#allocation4 + $0xe8] ss:$16 sps:$4 sm:$0xff]   ;;  %v3777_v58 = vld [vmem:[#allocation4 + $0x104] ss:$16 sps:$4 sm:$0xff]  }
  0xe1   :  { %1399 = vmatprep.subr.bf16.mxu0 %v3693_v59  ;;  %1571 = vmatprep.subr.bf16.mxu1 %v3696_v60  ;;  %v3780_v59 = vld [vmem:[#allocation4 + $0x10c] ss:$16 sps:$4 sm:$0xff]   ;;  %v3775_v60 = vld [vmem:[#allocation4 + $0x100] ss:$16 sps:$4 sm:$0xff]  }
  0xe4   :  { %1400 = vmatpush1.bf16.msra.mxu0 %v3691_v61  ;;  %1572 = vmatpush1.bf16.msra.mxu1 %v3694_v62  ;;  %v3778_v61 = vld [vmem:[#allocation4 + $0x108] ss:$16 sps:$4 sm:$0xff]   ;;  %v3783_v62 = vld [vmem:[#allocation4 + $0x124] ss:$16 sps:$4 sm:$0xff]  }
  0xe5   :  { %1401 = vmatprep.subr.bf16.mxu0 %v3699_v63  ;;  %1573 = vmatprep.subr.bf16.mxu1 %v3702_v0  ;;  %v3786_v63 = vld [vmem:[#allocation4 + $0x12c] ss:$16 sps:$4 sm:$0xff]   ;;  %v3781_v0 = vld [vmem:[#allocation4 + $0x120] ss:$16 sps:$4 sm:$0xff]  }
  0xe8   :  { %1402 = vmatpush1.bf16.msra.mxu0 %v3697_v1  ;;  %1574 = vmatpush1.bf16.msra.mxu1 %v3700_v2  ;;  %v3784_v1 = vld [vmem:[#allocation4 + $0x128] ss:$16 sps:$4 sm:$0xff]   ;;  %v3789_v2 = vld [vmem:[#allocation4 + $0x144] ss:$16 sps:$4 sm:$0xff]  }
  0xe9   :  { %1403 = vmatprep.subr.bf16.mxu0 %v3705_v3  ;;  %1575 = vmatprep.subr.bf16.mxu1 %v3708_v4  ;;  %v3792_v3 = vld [vmem:[#allocation4 + $0x14c] ss:$16 sps:$4 sm:$0xff]   ;;  %v3787_v4 = vld [vmem:[#allocation4 + $0x140] ss:$16 sps:$4 sm:$0xff]  }
  0xec   :  { %1404 = vmatpush1.bf16.msra.mxu0 %v3703_v5  ;;  %1576 = vmatpush1.bf16.msra.mxu1 %v3706_v6  ;;  %v3790_v5 = vld [vmem:[#allocation4 + $0x148] ss:$16 sps:$4 sm:$0xff]   ;;  %v3795_v6 = vld [vmem:[#allocation4 + $0x164] ss:$16 sps:$4 sm:$0xff]  }
  0xed   :  { %1405 = vmatprep.subr.bf16.mxu0 %v3711_v7  ;;  %1577 = vmatprep.subr.bf16.mxu1 %v3714_v8  ;;  %v3798_v7 = vld [vmem:[#allocation4 + $0x16c] ss:$16 sps:$4 sm:$0xff]   ;;  %v3793_v8 = vld [vmem:[#allocation4 + $0x160] ss:$16 sps:$4 sm:$0xff]  }
  0xf0   :  { %1406 = vmatpush1.bf16.msra.mxu0 %v3709_v9  ;;  %1578 = vmatpush1.bf16.msra.mxu1 %v3712_v10  ;;  %v3796_v9 = vld [vmem:[#allocation4 + $0x168] ss:$16 sps:$4 sm:$0xff]   ;;  %v3801_v10 = vld [vmem:[#allocation4 + $0x184] ss:$16 sps:$4 sm:$0xff]  }
  0xf1   :  { %1407 = vmatprep.subr.bf16.mxu0 %v3717_v11  ;;  %1579 = vmatprep.subr.bf16.mxu1 %v3720_v12  ;;  %v3804_v11 = vld [vmem:[#allocation4 + $0x18c] ss:$16 sps:$4 sm:$0xff]   ;;  %v3799_v12 = vld [vmem:[#allocation4 + $0x180] ss:$16 sps:$4 sm:$0xff]  }
  0xf4   :  { %1408 = vmatpush1.bf16.msra.mxu0 %v3715_v13  ;;  %1580 = vmatpush1.bf16.msra.mxu1 %v3718_v14  ;;  %v3802_v13 = vld [vmem:[#allocation4 + $0x188] ss:$16 sps:$4 sm:$0xff]   ;;  %v3807_v14 = vld [vmem:[#allocation4 + $0x1a4] ss:$16 sps:$4 sm:$0xff]  }
  0xf5   :  { %1420 = vmatprep.subr.bf16.mxu0 %v3723_v17  ;;  %1592 = vmatprep.subr.bf16.mxu1 %v3726_v18  ;;  %v3808_v17 = vld [vmem:[#allocation4 + $0x1a8] ss:$16 sps:$4 sm:$0xff]   ;;  %v3813_v18 = vld [vmem:[#allocation4 + $0x1c4] ss:$16 sps:$4 sm:$0xff]  }
  0xf7   :  { %1410 = vmatmul.mubr.bf16.vlgmr.msra.gmra.mrb[0].mxu0 %v86_v21  ;;  %1582 = vmatmul.mubr.bf16.vlgmr.msra.gmra.mrb[0].mxu1 %v86_v21  ;;  %v3814_v21 = vld [vmem:[#allocation4 + $0x1c8] ss:$16 sps:$4 sm:$0xff]  }
  0xf8   :  { %1421 = vmatpush1.bf16.msra.mxu0 %v3721_v19  ;;  %1593 = vmatpush1.bf16.msra.mxu1 %v3724_v20  ;;  %v3816_v19 = vld [vmem:[#allocation4 + $0x1cc] ss:$16 sps:$4 sm:$0xff]   ;;  %v3811_v20 = vld [vmem:[#allocation4 + $0x1c0] ss:$16 sps:$4 sm:$0xff]  }
  0xf9   :  { %1452 = vmatprep.mubr.bf16.mxu0 %v4028_v24  ;;  %1624 = vmatprep.mubr.bf16.mxu1 %v4028_v24  ;;  %v3817_v24 = vld [vmem:[#allocation4 + $0x1e0] ss:$16 sps:$4 sm:$0xff]  }
  0xfa   :  { %2437 = vmatprep.subr.bf16.mxu0 %v3729_v22  ;;  %2523 = vmatprep.subr.bf16.mxu1 %v3732_v23  ;;  %v3819_v22 = vld [vmem:[#allocation4 + $0x1e4] ss:$16 sps:$4 sm:$0xff]   ;;  %v3822_v23 = vld [vmem:[#allocation4 + $0x1ec] ss:$16 sps:$4 sm:$0xff]  }
 0x103   :  { %3170 = vmatmul.mubr.msk.bf16.vlgmr.msra.gmra.mrb[0].mxu0 %vm1287_vm0, %v88_v29  ;;  %3171 = vmatmul.mubr.msk.bf16.vlgmr.msra.gmra.mrb[0].mxu1 %vm1287_vm0, %v88_v29 }
 0x104   :  { %2438 = vmatpush1.bf16.msra.mxu0 %v3727_v27  ;;  %2524 = vmatpush1.bf16.msra.mxu1 %v3730_v28  ;;  %v3828_v27 = vld [vmem:[#allocation4 + $0x20c] ss:$16 sps:$4 sm:$0xff]   ;;  %v287_v28 = vlaneseq }
 0x105   :  { %2439 = vmatprep.subr.bf16.mxu0 %v3735_v30  ;;  %2525 = vmatprep.subr.bf16.mxu1 %v3738_v31 }
 0x106   :  { %v4156_v29 = vshrl.u32 %v287_v28, 7  ;;  %v3862_v28 = vld [vmem:[#allocation4 + $0x2c8] ss:$16 sps:$4 sm:$0xff]  }
 0x108   :  { %2440 = vmatpush1.bf16.msra.mxu0 %v3733_v32  ;;  %2526 = vmatpush1.bf16.msra.mxu1 %v3736_v33  ;;  %v289_v30 = vsub.s32 0, %v4156_v29  ;;  %v297_v31 = vsub.s32 2, %v4156_v29  ;;  %v285_v32 = vld [vmem:[%s4199_s2] sm:$0xf]  ;;  %v293_v33 = vsub.s32 1, %v4156_v29 }
 0x109   :  { %2441 = vmatprep.subr.bf16.mxu0 %v3741_v34  ;;  %2527 = vmatprep.subr.bf16.mxu1 %v3744_v35  ;;  %v301_v34 = vsub.s32 3, %v4156_v29 }
 0x10a   :  { %v290_v35 = vrot.slane %v285_v32, %v289_v30 }
 0x10c   :  { %2442 = vmatpush1.bf16.msra.mxu0 %v3739_v36  ;;  %2528 = vmatpush1.bf16.msra.mxu1 %v3742_v37  ;;  %v298_v36 = vrot.slane %v285_v32, %v297_v31  ;;  %v294_v37 = vrot.slane %v285_v32, %v293_v33 }
 0x10d   :  { %2443 = vmatprep.subr.bf16.mxu0 %v3747_v38  ;;  %2529 = vmatprep.subr.bf16.mxu1 %v3750_v39  ;;  %v302_v38 = vrot.slane %v285_v32, %v301_v34  ;;  %v3867_v32 = vld [vmem:[#allocation4 + $0x2e4] ss:$16 sps:$4 sm:$0xff]  }
 0x110   :  { %2444 = vmatpush1.bf16.msra.mxu0 %v3745_v40  ;;  %2530 = vmatpush1.bf16.msra.mxu1 %v3748_v41 }
 0x111   :  { %2445 = vmatprep.subr.bf16.mxu0 %v3753_v42  ;;  %2531 = vmatprep.subr.bf16.mxu1 %v3756_v43 }
 0x114   :  { %2446 = vmatpush1.bf16.msra.mxu0 %v3751_v44  ;;  %2532 = vmatpush1.bf16.msra.mxu1 %v3754_v45 }
 0x115   :  { %2447 = vmatprep.subr.bf16.mxu0 %v3759_v46  ;;  %2533 = vmatprep.subr.bf16.mxu1 %v3762_v47 }
 0x118   :  { %2448 = vmatpush1.bf16.msra.mxu0 %v3757_v48  ;;  %2534 = vmatpush1.bf16.msra.mxu1 %v3760_v49 }
 0x119   :  { %2449 = vmatprep.subr.bf16.mxu0 %v3765_v50  ;;  %2535 = vmatprep.subr.bf16.mxu1 %v3768_v51 }
 0x11c   :  { %2450 = vmatpush1.bf16.msra.mxu0 %v3763_v52  ;;  %2536 = vmatpush1.bf16.msra.mxu1 %v3766_v53 }
 0x11d   :  { %2451 = vmatprep.subr.bf16.mxu0 %v3771_v54  ;;  %2537 = vmatprep.subr.bf16.mxu1 %v3774_v55 }
 0x120   :  { %2452 = vmatpush1.bf16.msra.mxu0 %v3769_v56  ;;  %2538 = vmatpush1.bf16.msra.mxu1 %v3772_v57 }
 0x121   :  { %2453 = vmatprep.subr.bf16.mxu0 %v3777_v58  ;;  %2539 = vmatprep.subr.bf16.mxu1 %v3780_v59 }
 0x124   :  { %2454 = vmatpush1.bf16.msra.mxu0 %v3775_v60  ;;  %2540 = vmatpush1.bf16.msra.mxu1 %v3778_v61 }
 0x125   :  { %2455 = vmatprep.subr.bf16.mxu0 %v3783_v62  ;;  %2541 = vmatprep.subr.bf16.mxu1 %v3786_v63 }
 0x128   :  { %2456 = vmatpush1.bf16.msra.mxu0 %v3781_v0  ;;  %2542 = vmatpush1.bf16.msra.mxu1 %v3784_v1 }
 0x129   :  { %2457 = vmatprep.subr.bf16.mxu0 %v3789_v2  ;;  %2543 = vmatprep.subr.bf16.mxu1 %v3792_v3  ;;  %v3823_v3 = vld [vmem:[#allocation4 + $0x200] ss:$16 sps:$4 sm:$0xff]  }
 0x12c   :  { %2458 = vmatpush1.bf16.msra.mxu0 %v3787_v4  ;;  %2544 = vmatpush1.bf16.msra.mxu1 %v3790_v5  ;;  %v3826_v4 = vld [vmem:[#allocation4 + $0x208] ss:$16 sps:$4 sm:$0xff]   ;;  %v3831_v5 = vld [vmem:[#allocation4 + $0x224] ss:$16 sps:$4 sm:$0xff]  }
 0x12d   :  { %2459 = vmatprep.subr.bf16.mxu0 %v3795_v6  ;;  %2545 = vmatprep.subr.bf16.mxu1 %v3798_v7  ;;  %v3834_v6 = vld [vmem:[#allocation4 + $0x22c] ss:$16 sps:$4 sm:$0xff]   ;;  %v3829_v7 = vld [vmem:[#allocation4 + $0x220] ss:$16 sps:$4 sm:$0xff]  }
 0x130   :  { %2460 = vmatpush1.bf16.msra.mxu0 %v3793_v8  ;;  %2546 = vmatpush1.bf16.msra.mxu1 %v3796_v9  ;;  %v3832_v8 = vld [vmem:[#allocation4 + $0x228] ss:$16 sps:$4 sm:$0xff]   ;;  %v3837_v9 = vld [vmem:[#allocation4 + $0x244] ss:$16 sps:$4 sm:$0xff]  }
 0x131   :  { %2461 = vmatprep.subr.bf16.mxu0 %v3801_v10  ;;  %2547 = vmatprep.subr.bf16.mxu1 %v3804_v11  ;;  %v3840_v10 = vld [vmem:[#allocation4 + $0x24c] ss:$16 sps:$4 sm:$0xff]   ;;  %v3835_v11 = vld [vmem:[#allocation4 + $0x240] ss:$16 sps:$4 sm:$0xff]  }
 0x134   :  { %2462 = vmatpush1.bf16.msra.mxu0 %v3799_v12  ;;  %2548 = vmatpush1.bf16.msra.mxu1 %v3802_v13  ;;  %v3838_v12 = vld [vmem:[#allocation4 + $0x248] ss:$16 sps:$4 sm:$0xff]   ;;  %v3843_v13 = vld [vmem:[#allocation4 + $0x264] ss:$16 sps:$4 sm:$0xff]  }
 0x135   :  { %2463 = vmatprep.subr.bf16.mxu0 %v3807_v14  ;;  %2549 = vmatprep.subr.bf16.mxu1 %v3810_v15  ;;  %v3846_v14 = vld [vmem:[#allocation4 + $0x26c] ss:$16 sps:$4 sm:$0xff]   ;;  %v3841_v15 = vld [vmem:[#allocation4 + $0x260] ss:$16 sps:$4 sm:$0xff]  }
 0x138   :  { %2464 = vmatpush1.bf16.msra.mxu0 %v3805_v16  ;;  %2550 = vmatpush1.bf16.msra.mxu1 %v3808_v17  ;;  %v3844_v16 = vld [vmem:[#allocation4 + $0x268] ss:$16 sps:$4 sm:$0xff]   ;;  %v3849_v17 = vld [vmem:[#allocation4 + $0x284] ss:$16 sps:$4 sm:$0xff]  }
 0x139   :  { %2465 = vmatprep.subr.bf16.mxu0 %v3813_v18  ;;  %2551 = vmatprep.subr.bf16.mxu1 %v3816_v19  ;;  %v3852_v18 = vld [vmem:[#allocation4 + $0x28c] ss:$16 sps:$4 sm:$0xff]   ;;  %v3847_v19 = vld [vmem:[#allocation4 + $0x280] ss:$16 sps:$4 sm:$0xff]  }
 0x13c   :  { %2466 = vmatpush1.bf16.msra.mxu0 %v3811_v20  ;;  %2552 = vmatpush1.bf16.msra.mxu1 %v3814_v21  ;;  %v3850_v20 = vld [vmem:[#allocation4 + $0x288] ss:$16 sps:$4 sm:$0xff]   ;;  %v3855_v21 = vld [vmem:[#allocation4 + $0x2a4] ss:$16 sps:$4 sm:$0xff]  }
 0x13d   :  { %2467 = vmatprep.subr.bf16.mxu0 %v3819_v22  ;;  %2553 = vmatprep.subr.bf16.mxu1 %v3822_v23  ;;  %v3858_v22 = vld [vmem:[#allocation4 + $0x2ac] ss:$16 sps:$4 sm:$0xff]   ;;  %v3853_v23 = vld [vmem:[#allocation4 + $0x2a0] ss:$16 sps:$4 sm:$0xff]  }
 0x140   :  { %2468 = vmatpush1.bf16.msra.mxu0 %v3817_v24  ;;  %2554 = vmatpush1.bf16.msra.mxu1 %v3820_v25  ;;  %v3856_v24 = vld [vmem:[#allocation4 + $0x2a8] ss:$16 sps:$4 sm:$0xff]   ;;  %v3861_v25 = vld [vmem:[#allocation4 + $0x2c4] ss:$16 sps:$4 sm:$0xff]  }
 0x141   :  { %2480 = vmatprep.subr.bf16.mxu0 %v3825_v26  ;;  %2566 = vmatprep.subr.bf16.mxu1 %v3828_v27  ;;  %v3864_v26 = vld [vmem:[#allocation4 + $0x2cc] ss:$16 sps:$4 sm:$0xff]   ;;  %v3859_v27 = vld [vmem:[#allocation4 + $0x2c0] ss:$16 sps:$4 sm:$0xff]  }
 0x1d6   :  { %v1454_v39 = vpop.f32.mrb[0].mxu0  ;;  %v1626_v40 = vpop.f32.mrb[0].mxu1 }
 0x1d7   :  { %v3377_v41 = vadd.f32 %v1454_v39, %v290_v35  ;;  %v3381_v42 = vadd.f32 %v1626_v40, %v298_v36  ;;  %v1456_v43 = vpop.f32.mrb[1].mxu0  ;;  %v1628_v44 = vpop.f32.mrb[1].mxu1  ;;  %v3876_v39 = vld [vmem:[#allocation4 + $0x30c] ss:$16 sps:$4 sm:$0xff]   ;;  %v3871_v40 = vld [vmem:[#allocation4 + $0x300] ss:$16 sps:$4 sm:$0xff]  }
 0x1d8   :  { %v3378_v45 = vadd.f32 %v1456_v43, %v294_v37  ;;  %v3382_v46 = vadd.f32 %v1628_v44, %v302_v38  ;;  %v1458_v47 = vpop.f32.mrb[2].mxu0  ;;  %v1630_v48 = vpop.f32.mrb[2].mxu1  ;;  %v3882_v43 = vld [vmem:[#allocation4 + $0x32c] ss:$16 sps:$4 sm:$0xff]   ;;  %v3877_v44 = vld [vmem:[#allocation4 + $0x320] ss:$16 sps:$4 sm:$0xff]  }
 0x1d9   :  { %v3379_v49 = vadd.f32 %v1458_v47, %v290_v35  ;;  %v3383_v50 = vadd.f32 %v1630_v48, %v298_v36  ;;  %v1460_v51 = vpop.f32.mrb[3].mxu0  ;;  %v1632_v52 = vpop.f32.mrb[3].mxu1  ;;  %v1635_v55 = vmax.f32 %v3377_v41, 0.0  ;;  %v1637_v56 = vmax.f32 %v3381_v42, 0.0  ;;  %v3870_v35 = vld [vmem:[#allocation4 + $0x2ec] ss:$16 sps:$4 sm:$0xff]  }
 0x1da   :  { %v3380_v53 = vadd.f32 %v1460_v51, %v294_v37  ;;  %v3384_v54 = vadd.f32 %v1632_v52, %v302_v38  ;;  %v1636_v59 = vmax.f32 %v3378_v45, 0.0  ;;  %v1638_v60 = vmax.f32 %v3382_v46, 0.0  ;;  %v3865_v36 = vld [vmem:[#allocation4 + $0x2e0] ss:$16 sps:$4 sm:$0xff]   ;;  %v3868_v37 = vld [vmem:[#allocation4 + $0x2e8] ss:$16 sps:$4 sm:$0xff]  }
 0x1db   :  { %v1639_v57 = vmax.f32 %v3379_v49, 0.0  ;;  %v1641_v58 = vmax.f32 %v3383_v50, 0.0  ;;  %v3873_v38 = vld [vmem:[#allocation4 + $0x304] ss:$16 sps:$4 sm:$0xff]   ;;  %v3874_v41 = vld [vmem:[#allocation4 + $0x308] ss:$16 sps:$4 sm:$0xff]  }
 0x1dc   :  { %v1640_v61 = vmax.f32 %v3380_v53, 0.0  ;;  %v1642_v62 = vmax.f32 %v3384_v54, 0.0  ;;  %v3879_v42 = vld [vmem:[#allocation4 + $0x324] ss:$16 sps:$4 sm:$0xff]   ;;  %v3880_v45 = vld [vmem:[#allocation4 + $0x328] ss:$16 sps:$4 sm:$0xff]  }
 0x1dd   :  { %v1643_v63 = vpack.c.bf16 %v1639_v57, %v1635_v55  ;;  %v4173_v0 = vpack.c.bf16 %v1641_v58, %v1637_v56  ;;  %v3885_v46 = vld [vmem:[#allocation4 + $0x344] ss:$16 sps:$4 sm:$0xff]   ;;  %v3888_v47 = vld [vmem:[#allocation4 + $0x34c] ss:$16 sps:$4 sm:$0xff]   ;;  %v3883_v48 = vld [vmem:[#allocation4 + $0x340] ss:$16 sps:$4 sm:$0xff]  }
 0x1de   :  { %v1644_v1 = vpack.c.bf16 %v1640_v61, %v1636_v59  ;;  %v1646_v2 = vpack.c.bf16 %v1642_v62, %v1638_v60  ;;  %v3886_v49 = vld [vmem:[#allocation4 + $0x348] ss:$16 sps:$4 sm:$0xff]   ;;  %v3891_v50 = vld [vmem:[#allocation4 + $0x364] ss:$16 sps:$4 sm:$0xff]   ;;  %v3894_v51 = vld [vmem:[#allocation4 + $0x36c] ss:$16 sps:$4 sm:$0xff]  }
 0x1df   :  { %v3889_v52 = vld [vmem:[#allocation4 + $0x360] ss:$16 sps:$4 sm:$0xff]   ;;  %v3892_v53 = vld [vmem:[#allocation4 + $0x368] ss:$16 sps:$4 sm:$0xff]   ;;  %v3897_v54 = vld [vmem:[#allocation4 + $0x384] ss:$16 sps:$4 sm:$0xff]  }
 0x1e0   :  { %2469 = vmatprep.mubr.bf16.mxu0 %v1644_v1  ;;  %2555 = vmatprep.mubr.bf16.mxu1 %v1644_v1  ;;  %v3900_v55 = vld [vmem:[#allocation4 + $0x38c] ss:$16 sps:$4 sm:$0xff]   ;;  %v3895_v56 = vld [vmem:[#allocation4 + $0x380] ss:$16 sps:$4 sm:$0xff]   ;;  %v3898_v57 = vld [vmem:[#allocation4 + $0x388] ss:$16 sps:$4 sm:$0xff]  }
 0x1e1   :  { %2470 = vmatmul.mubr.bf16.vlgmr.msra.gmra.mrb[4].mxu0 %v1643_v63  ;;  %2556 = vmatmul.mubr.bf16.vlgmr.msra.gmra.mrb[4].mxu1 %v1643_v63  ;;  %v3903_v58 = vld [vmem:[#allocation4 + $0x3a4] ss:$16 sps:$4 sm:$0xff]   ;;  %v3906_v59 = vld [vmem:[#allocation4 + $0x3ac] ss:$16 sps:$4 sm:$0xff]   ;;  %v3901_v60 = vld [vmem:[#allocation4 + $0x3a0] ss:$16 sps:$4 sm:$0xff]  }
 0x1e2   :  { %2481 = vmatpush1.bf16.msra.mxu0 %v3823_v3  ;;  %2567 = vmatpush1.bf16.msra.mxu1 %v3826_v4  ;;  %v3904_v61 = vld [vmem:[#allocation4 + $0x3a8] ss:$16 sps:$4 sm:$0xff]   ;;  %v3909_v62 = vld [vmem:[#allocation4 + $0x3c4] ss:$16 sps:$4 sm:$0xff]   ;;  %v3912_v63 = vld [vmem:[#allocation4 + $0x3cc] ss:$16 sps:$4 sm:$0xff]  }
 0x1e3   :  { %2512 = vmatprep.mubr.bf16.mxu0 %v1646_v2  ;;  %2598 = vmatprep.mubr.bf16.mxu1 %v1646_v2  ;;  %v3907_v1 = vld [vmem:[#allocation4 + $0x3c0] ss:$16 sps:$4 sm:$0xff]   ;;  %v3910_v2 = vld [vmem:[#allocation4 + $0x3c8] ss:$16 sps:$4 sm:$0xff]   ;;  %v3915_v3 = vld [vmem:[#allocation4 + $0x3e4] ss:$16 sps:$4 sm:$0xff]  }
 0x1e4   :  { %2482 = vmatprep.subr.bf16.mxu0 %v3831_v5  ;;  %2568 = vmatprep.subr.bf16.mxu1 %v3834_v6  ;;  %v3918_v4 = vld [vmem:[#allocation4 + $0x3ec] ss:$16 sps:$4 sm:$0xff]   ;;  %v3913_v5 = vld [vmem:[#allocation4 + $0x3e0] ss:$16 sps:$4 sm:$0xff]   ;;  %v3916_v6 = vld [vmem:[#allocation4 + $0x3e8] ss:$16 sps:$4 sm:$0xff]  }
 0x1e6   :  { %2483 = vmatpush1.bf16.msra.mxu0 %v3829_v7  ;;  %2569 = vmatpush1.bf16.msra.mxu1 %v3832_v8  ;;  %v3919_v7 = vld [vmem:[#allocation6 + $0x40] sm:$0xff]  }
 0x1e7   :  { %2484 = vmatprep.subr.bf16.mxu0 %v3837_v9  ;;  %2570 = vmatprep.subr.bf16.mxu1 %v3840_v10  ;;  %v3920_v8 = vld [vmem:[#allocation6 + $0xc0] sm:$0xff]  }
 0x1e8   :  { %v3921_v9 = vld [vmem:[#allocation6] sm:$0xff]  }
 0x1e9   :  { %v3922_v10 = vld [vmem:[#allocation6 + $0x80] sm:$0xff]  }
 0x1ea   :  { %2485 = vmatpush1.bf16.msra.mxu0 %v3835_v11  ;;  %2571 = vmatpush1.bf16.msra.mxu1 %v3838_v12  ;;  %v3923_v11 = vld [vmem:[#allocation6 + $0x48] sm:$0xff]  }
 0x1eb   :  { %2486 = vmatprep.subr.bf16.mxu0 %v3843_v13  ;;  %2572 = vmatprep.subr.bf16.mxu1 %v3846_v14  ;;  %v3924_v12 = vld [vmem:[#allocation6 + $0xc8] sm:$0xff]  }
 0x1ec   :  { %v3925_v13 = vld [vmem:[#allocation6 + $0x8] sm:$0xff]  }
 0x1ed   :  { %v3926_v14 = vld [vmem:[#allocation6 + $0x88] sm:$0xff]  }
 0x1ee   :  { %2487 = vmatpush1.bf16.msra.mxu0 %v3841_v15  ;;  %2573 = vmatpush1.bf16.msra.mxu1 %v3844_v16  ;;  %v3927_v15 = vld [vmem:[#allocation6 + $0x50] sm:$0xff]  }
 0x1ef   :  { %2488 = vmatprep.subr.bf16.mxu0 %v3849_v17  ;;  %2574 = vmatprep.subr.bf16.mxu1 %v3852_v18  ;;  %v3928_v16 = vld [vmem:[#allocation6 + $0xd0] sm:$0xff]  }
 0x1f0   :  { %v3929_v17 = vld [vmem:[#allocation6 + $0x10] sm:$0xff]  }
 0x1f1   :  { %v3930_v18 = vld [vmem:[#allocation6 + $0x90] sm:$0xff]  }
 0x1f2   :  { %2489 = vmatpush1.bf16.msra.mxu0 %v3847_v19  ;;  %2575 = vmatpush1.bf16.msra.mxu1 %v3850_v20  ;;  %v3931_v19 = vld [vmem:[#allocation6 + $0x58] sm:$0xff]  }
 0x1f3   :  { %2490 = vmatprep.subr.bf16.mxu0 %v3855_v21  ;;  %2576 = vmatprep.subr.bf16.mxu1 %v3858_v22  ;;  %v3932_v20 = vld [vmem:[#allocation6 + $0xd8] sm:$0xff]   ;;  %v3935_v22 = vld [vmem:[#allocation6 + $0x60] sm:$0xff]  }
 0x1f4   :  { %v3933_v21 = vld [vmem:[#allocation6 + $0x18] sm:$0xff]  }
 0x1f6   :  { %2491 = vmatpush1.bf16.msra.mxu0 %v3853_v23  ;;  %2577 = vmatpush1.bf16.msra.mxu1 %v3856_v24  ;;  %v3936_v23 = vld [vmem:[#allocation6 + $0xe0] sm:$0xff]  }
 0x1f7   :  { %2492 = vmatprep.subr.bf16.mxu0 %v3861_v25  ;;  %2578 = vmatprep.subr.bf16.mxu1 %v3864_v26  ;;  %v3937_v24 = vld [vmem:[#allocation6 + $0x20] sm:$0xff]   ;;  %v3939_v26 = vld [vmem:[#allocation6 + $0x68] sm:$0xff]  }
 0x1f8   :  { %v3938_v25 = vld [vmem:[#allocation6 + $0xa0] sm:$0xff]  }
 0x1fa   :  { %2493 = vmatpush1.bf16.msra.mxu0 %v3859_v27  ;;  %2579 = vmatpush1.bf16.msra.mxu1 %v3862_v28  ;;  %v3940_v27 = vld [vmem:[#allocation6 + $0xe8] sm:$0xff]  }
 0x1fb   :  { %2494 = vmatprep.subr.bf16.mxu0 %v3867_v32  ;;  %2580 = vmatprep.subr.bf16.mxu1 %v3870_v35  ;;  %v3941_v28 = vld [vmem:[#allocation6 + $0x28] sm:$0xff]   ;;  %v3943_v35 = vld [vmem:[#allocation6 + $0x70] sm:$0xff]  }
 0x1fc   :  { %v3942_v32 = vld [vmem:[#allocation6 + $0xa8] sm:$0xff]  }
 0x1fe   :  { %2495 = vmatpush1.bf16.msra.mxu0 %v3865_v36  ;;  %2581 = vmatpush1.bf16.msra.mxu1 %v3868_v37  ;;  %v3944_v36 = vld [vmem:[#allocation6 + $0xf0] sm:$0xff]  }
 0x1ff   :  { %2496 = vmatprep.subr.bf16.mxu0 %v3873_v38  ;;  %2582 = vmatprep.subr.bf16.mxu1 %v3876_v39  ;;  %v3945_v37 = vld [vmem:[#allocation6 + $0x30] sm:$0xff]   ;;  %v3947_v39 = vld [vmem:[#allocation6 + $0x78] sm:$0xff]  }
 0x200   :  { %v3946_v38 = vld [vmem:[#allocation6 + $0xb0] sm:$0xff]  }
 0x202   :  { %2497 = vmatpush1.bf16.msra.mxu0 %v3871_v40  ;;  %2583 = vmatpush1.bf16.msra.mxu1 %v3874_v41  ;;  %v3948_v40 = vld [vmem:[#allocation6 + $0xf8] sm:$0xff]  }
 0x203   :  { %2498 = vmatprep.subr.bf16.mxu0 %v3879_v42  ;;  %2584 = vmatprep.subr.bf16.mxu1 %v3882_v43  ;;  %v3949_v41 = vld [vmem:[#allocation6 + $0x38] sm:$0xff]   ;;  %v1775_v43 = vld [vmem:[%s4201_s4] sm:$0xf] }
 0x204   :  { %v3950_v42 = vld [vmem:[#allocation6 + $0xb8] sm:$0xff]  }
 0x206   :  { %2499 = vmatpush1.bf16.msra.mxu0 %v3877_v44  ;;  %2585 = vmatpush1.bf16.msra.mxu1 %v3880_v45  ;;  %v1780_v44 = vrot.slane %v1775_v43, %v289_v30  ;;  %v1788_v45 = vrot.slane %v1775_v43, %v297_v31 }
 0x207   :  { %2500 = vmatprep.subr.bf16.mxu0 %v3885_v46  ;;  %2586 = vmatprep.subr.bf16.mxu1 %v3888_v47  ;;  %v1784_v46 = vrot.slane %v1775_v43, %v293_v33  ;;  %v1792_v47 = vrot.slane %v1775_v43, %v301_v34 }
 0x20a   :  { %2501 = vmatpush1.bf16.msra.mxu0 %v3883_v48  ;;  %2587 = vmatpush1.bf16.msra.mxu1 %v3886_v49 }
 0x20b   :  { %2502 = vmatprep.subr.bf16.mxu0 %v3891_v50  ;;  %2588 = vmatprep.subr.bf16.mxu1 %v3894_v51 }
 0x20e   :  { %2503 = vmatpush1.bf16.msra.mxu0 %v3889_v52  ;;  %2589 = vmatpush1.bf16.msra.mxu1 %v3892_v53 }
 0x20f   :  { %2504 = vmatprep.subr.bf16.mxu0 %v3897_v54  ;;  %2590 = vmatprep.subr.bf16.mxu1 %v3900_v55 }
 0x212   :  { %2505 = vmatpush1.bf16.msra.mxu0 %v3895_v56  ;;  %2591 = vmatpush1.bf16.msra.mxu1 %v3898_v57 }
 0x213   :  { %2506 = vmatprep.subr.bf16.mxu0 %v3903_v58  ;;  %2592 = vmatprep.subr.bf16.mxu1 %v3906_v59 }
 0x216   :  { %2507 = vmatpush1.bf16.msra.mxu0 %v3901_v60  ;;  %2593 = vmatpush1.bf16.msra.mxu1 %v3904_v61 }
 0x217   :  { %2508 = vmatprep.subr.bf16.mxu0 %v3909_v62  ;;  %2594 = vmatprep.subr.bf16.mxu1 %v3912_v63 }
 0x21a   :  { %2509 = vmatpush1.bf16.msra.mxu0 %v3907_v1  ;;  %2595 = vmatpush1.bf16.msra.mxu1 %v3910_v2 }
 0x21b   :  { %2510 = vmatprep.subr.bf16.mxu0 %v3915_v3  ;;  %2596 = vmatprep.subr.bf16.mxu1 %v3918_v4 }
 0x21e   :  { %2511 = vmatpush1.bf16.msra.mxu0 %v3913_v5  ;;  %2597 = vmatpush1.bf16.msra.mxu1 %v3916_v6 }
 0x21f   :  { %3333 = vmatprep.subr.bf16.mxu0 %v3919_v7  ;;  %3355 = vmatprep.subr.bf16.mxu1 %v3920_v8 }
 0x221   :  { %2513 = vmatmul.mubr.bf16.vlgmr.msra.gmra.mrb[4].mxu0 %v4173_v0  ;;  %2599 = vmatmul.mubr.bf16.vlgmr.msra.gmra.mrb[4].mxu1 %v4173_v0  ;;  %v3934_v0 = vld [vmem:[#allocation6 + $0x98] sm:$0xff]  }
 0x222   :  { %3334 = vmatpush3.bf16.msra.mxu0 %v3921_v9  ;;  %3356 = vmatpush3.bf16.msra.mxu1 %v3922_v10  ;;  %v3300_v10 = vld [vmem:[%s4203_s6] ss:$0 sm:$0xff] }
 0x223   :  { %3335 = vmatprep.subr.bf16.mxu0 %v3923_v11  ;;  %3357 = vmatprep.subr.bf16.mxu1 %v3924_v12 }
 0x226   :  { %3336 = vmatpush3.bf16.msra.mxu0 %v3925_v13  ;;  %3358 = vmatpush3.bf16.msra.mxu1 %v3926_v14 }
 0x227   :  { %3337 = vmatprep.subr.bf16.mxu0 %v3927_v15  ;;  %3359 = vmatprep.subr.bf16.mxu1 %v3928_v16 }
 0x22a   :  { %3338 = vmatpush3.bf16.msra.mxu0 %v3929_v17  ;;  %3360 = vmatpush3.bf16.msra.mxu1 %v3930_v18 }
 0x22b   :  { %3339 = vmatprep.subr.bf16.mxu0 %v3931_v19  ;;  %3361 = vmatprep.subr.bf16.mxu1 %v3932_v20 }
 0x22e   :  { %3340 = vmatpush3.bf16.msra.mxu0 %v3933_v21  ;;  %3362 = vmatpush3.bf16.msra.mxu1 %v3934_v0 }
 0x22f   :  { %3341 = vmatprep.subr.bf16.mxu0 %v3935_v22  ;;  %3363 = vmatprep.subr.bf16.mxu1 %v3936_v23 }
 0x232   :  { %3342 = vmatpush3.bf16.msra.mxu0 %v3937_v24  ;;  %3364 = vmatpush3.bf16.msra.mxu1 %v3938_v25 }
 0x233   :  { %3343 = vmatprep.subr.bf16.mxu0 %v3939_v26  ;;  %3365 = vmatprep.subr.bf16.mxu1 %v3940_v27 }
 0x236   :  { %3344 = vmatpush3.bf16.msra.mxu0 %v3941_v28  ;;  %3366 = vmatpush3.bf16.msra.mxu1 %v3942_v32 }
 0x237   :  { %3345 = vmatprep.subr.bf16.mxu0 %v3943_v35  ;;  %3367 = vmatprep.subr.bf16.mxu1 %v3944_v36 }
 0x23a   :  { %3346 = vmatpush3.bf16.msra.mxu0 %v3945_v37  ;;  %3368 = vmatpush3.bf16.msra.mxu1 %v3946_v38 }
 0x23b   :  { %3347 = vmatprep.subr.bf16.mxu0 %v3947_v39  ;;  %3369 = vmatprep.subr.bf16.mxu1 %v3948_v40 }
 0x23e   :  { %3348 = vmatpush3.bf16.msra.mxu0 %v3949_v41  ;;  %3370 = vmatpush3.bf16.msra.mxu1 %v3950_v42 }
 0x2f4   :  { %v2514_v48 = vpop.f32.mrb[4].mxu0  ;;  %v2600_v49 = vpop.f32.mrb[4].mxu1 }
 0x2f5   :  { %v3385_v50 = vadd.f32 %v2514_v48, %v1780_v44  ;;  %v3389_v51 = vadd.f32 %v2600_v49, %v1788_v45  ;;  %v2516_v52 = vpop.f32.mrb[5].mxu0  ;;  %v2602_v53 = vpop.f32.mrb[5].mxu1 }
 0x2f6   :  { %v3386_v54 = vadd.f32 %v2516_v52, %v1784_v46  ;;  %v3390_v55 = vadd.f32 %v2602_v53, %v1792_v47  ;;  %v2518_v56 = vpop.f32.mrb[6].mxu0  ;;  %v2604_v57 = vpop.f32.mrb[6].mxu1 }
 0x2f7   :  { %v3387_v30 = vadd.f32 %v2518_v56, %v1780_v44  ;;  %v3391_v58 = vadd.f32 %v2604_v57, %v1788_v45  ;;  %v2520_v59 = vpop.f32.mrb[7].mxu0  ;;  %v2606_v31 = vpop.f32.mrb[7].mxu1  ;;  %v2609_v33 = vmax.f32 %v3385_v50, 0.0  ;;  %v2611_v62 = vmax.f32 %v3389_v51, 0.0 }
 0x2f8   :  { %v3388_v60 = vadd.f32 %v2520_v59, %v1784_v46  ;;  %v3392_v61 = vadd.f32 %v2606_v31, %v1792_v47  ;;  %v2610_v63 = vmax.f32 %v3386_v54, 0.0  ;;  %v2612_v1 = vmax.f32 %v3390_v55, 0.0 }
 0x2f9   :  { %v2613_v29 = vmax.f32 %v3387_v30, 0.0  ;;  %v2615_v34 = vmax.f32 %v3391_v58, 0.0 }
 0x2fa   :  { %v2614_v2 = vmax.f32 %v3388_v60, 0.0  ;;  %v2616_v3 = vmax.f32 %v3392_v61, 0.0 }
 0x2fb   :  { %v2617_v4 = vpack.c.bf16 %v2613_v29, %v2609_v33  ;;  %v2619_v5 = vpack.c.bf16 %v2615_v34, %v2611_v62 }
 0x2fc   :  { %v2618_v6 = vpack.c.bf16 %v2614_v2, %v2610_v63  ;;  %v2620_v7 = vpack.c.bf16 %v2616_v3, %v2612_v1 }
 0x2fe   :  { %2916 = vmatprep.mubr.bf16.mxu0 %v2618_v6  ;;  %2957 = vmatprep.mubr.bf16.mxu1 %v2620_v7 }
 0x2ff   :  { %2917 = vmatmul.mubr.bf16.vlgmr.msra.gmra.mrb[8].mxu0 %v2617_v4  ;;  %2958 = vmatmul.mubr.bf16.vlgmr.msra.gmra.mrb[8].mxu1 %v2619_v5 }
 0x3d2   :  { %v3349_v8 = vpop.f32.mrb[8].mxu0  ;;  %v3371_v9 = vpop.f32.mrb[8].mxu1 }
 0x3d3   :  { %v3350_v11 = vpop.f32.mrb[9].mxu0  ;;  %v3372_v12 = vpop.f32.mrb[9].mxu1 }
 0x3d4   :  { %v3351_v13 = vadd.f32 %v3350_v11, %v3349_v8  ;;  %v3373_v14 = vadd.f32 %v3372_v12, %v3371_v9  ;;  %v3352_v15 = vpop.f32.mrb[10].mxu0  ;;  %v3374_v16 = vpop.f32.mrb[10].mxu1 }
 0x3d5   :  { %v3353_v17 = vpop.f32.mrb[11].mxu0  ;;  %v3375_v18 = vpop.f32.mrb[11].mxu1 }
 0x3d6   :  { %v2919_v19 = vadd.f32 %v3351_v13, %v3300_v10  ;;  %v3354_v20 = vadd.f32 %v3353_v17, %v3352_v15  ;;  %v3376_v21 = vadd.f32 %v3375_v18, %v3374_v16 }
 0x3d8   :  { %v2960_v0 = vadd.f32 %v3373_v14, %v2919_v19  ;;  %v2922_v22 = vadd.f32 %v3354_v20, %v3300_v10 }
 0x3da   :  { %2966 = vst [vmem:[%s4204_s7] sm:$0xff] %v2960_v0  ;;  %v2963_v23 = vadd.f32 %v3376_v21, %v2922_v22 }
 0x3dc   :  { %2967 = vst [vmem:[%s4204_s7 + $0x8] sm:$0xff] %v2963_v23 }
 0x3dd   :  { %2972 = vsyncpa [#allocation3], 1 }
 0x3de   :  { %2973 = vsyncpa [#allocation5], 1 }

</bundles_post_ra>
